<compile_context>
chip_gen: v7x
topology: tpu7x:2x2x1
jax: 0.10.0
libtpu: 0.0.40
codegen_flags: <defaults>
</compile_context>

<pallas_src>
import functools

import jax
import jax.numpy as jnp
import numpy as np
from jax.experimental import pallas as pl
from jax.experimental.pallas import tpu as pltpu

EPS = 1e-5


def _vmem_limit_bytes():
    """Generation-aware VMEM budget (v7x has 64 MiB/TC vs 128 MiB on v5e/v6e)."""
    try:
        cap = int(pltpu.get_tpu_info().vmem_capacity_bytes)
    except Exception:
        cap = 64 * 1024 * 1024
    return max(32 * 1024 * 1024, min(cap * 3 // 4, 96 * 1024 * 1024))


def _round_up(x, m):
    return ((x + m - 1) // m) * m


# --------------------------------------------------------------------------
# In-kernel helper: channel-major 3x3 "same" conv of one image via a
# flat-padded, lane-dense im2col and a single MXU matmul.
# --------------------------------------------------------------------------
def _conv3x3_cm(a, w_ref, pad_ref, col_ref, H, W):
    """a:       (Cin, M) activation value, M = H*W flattened row-major (y*W + x).
    w_ref:   (Cout, 9*Cin) VMEM ref; columns ordered (dy, dx, cin).
    pad_ref: (Cin, pad_left + M + W + 1) VMEM scratch (lane-dense flat padding).
    col_ref: (9*Cin, M) VMEM scratch (transposed im2col).
    Returns  (Cout, M) float32.
    """
    C, M = a.shape
    a = a.astype(pad_ref.dtype)
    pad_left = pad_ref.shape[1] - M - W - 1   # 128-aligned left zero region

    # Zero halos: the whole aligned left region (one dense store) and the small
    # right tail; the image itself lands at a 128-aligned lane offset.
    pad_ref[:, 0:pad_left] = jnp.zeros((C, pad_left), pad_ref.dtype)
    pad_ref[:, pad_left + M:pad_left + M + W + 1] = jnp.zeros((C, W + 1),
                                                              pad_ref.dtype)
    pad_ref[:, pad_left:pad_left + M] = a

    # Horizontal validity masks (vertical out-of-image reads land in the zero
    # halos of the flat-padded buffer).
    x_idx = jax.lax.broadcasted_iota(jnp.int32, (1, M), 1) % W
    left_ok = x_idx >= 1          # needed for dx == -1
    right_ok = x_idx <= W - 2     # needed for dx == +1

    k = 0
    for dy in (-1, 0, 1):
        for dx in (-1, 0, 1):
            if dy == 0 and dx == 0:
                slab = a
            else:
                start = pad_left + dy * W + dx
                slab = pad_ref[:, start:start + M]     # lane-offset dense load
                if dx == -1:
                    slab = jnp.where(left_ok, slab, 0.0)
                elif dx == 1:
                    slab = jnp.where(right_ok, slab, 0.0)
            col_ref[k * C:(k + 1) * C, :] = slab       # lane-dense store
            k += 1

    # One matmul, K = 9*Cin, result lanes = H*W (fills the MXU output width).
    return jnp.dot(w_ref[...], col_ref[...], preferred_element_type=jnp.float32)


# --------------------------------------------------------------------------
# Kernel bodies (specialised on the static spatial size).
# --------------------------------------------------------------------------
def _make_conv_kernels(H, W):
    def conv_stats_kernel(x_ref, w_ref, y_ref, stat_ref, pad_ref, col_ref):
        # x_ref: (1, C, M)  w_ref: (C, 9C)  y_ref: (1, C, M)  stat_ref: (1, C, 2)
        y = _conv3x3_cm(x_ref[0], w_ref, pad_ref, col_ref, H, W)   # (C, M) f32
        y_ref[0] = y.astype(y_ref.dtype)
        # BN partial stats from the f32 accumulator (packed into one output).
        stat_ref[0, :, 0:1] = jnp.sum(y, axis=1, keepdims=True)
        stat_ref[0, :, 1:2] = jnp.sum(y * y, axis=1, keepdims=True)

    def bn_relu_conv_stats_kernel(y1_ref, s_ref, b_ref, w_ref,
                                  y2_ref, stat_ref, pad_ref, col_ref):
        # BN1 (precomputed affine) + ReLU on the VPU, then conv2 + BN2 stats.
        a = jnp.maximum(
            y1_ref[0].astype(jnp.float32) * s_ref[...] + b_ref[...], 0.0)
        y = _conv3x3_cm(a, w_ref, pad_ref, col_ref, H, W)          # (C, M) f32
        y2_ref[0] = y.astype(y2_ref.dtype)
        stat_ref[0, :, 0:1] = jnp.sum(y, axis=1, keepdims=True)
        stat_ref[0, :, 1:2] = jnp.sum(y * y, axis=1, keepdims=True)

    return conv_stats_kernel, bn_relu_conv_stats_kernel


def bn_residual_relu_kernel(y2_ref, x_ref, s_ref, b_ref, o_ref):
    # (1, C, M) blocks, lane axis = H*W (dense); scale/bias broadcast from (C,1).
    y = y2_ref[...].astype(jnp.float32)
    o_ref[...] = jnp.maximum(y * s_ref[...] + b_ref[...] + x_ref[...], 0.0)


# --------------------------------------------------------------------------
# pallas_call wrappers.
# --------------------------------------------------------------------------
def _conv_pass(kernel, inputs, in_specs, *, N, C, M, W,
               store_dtype, compute_dtype, vmem_limit):
    # TODO(synk): for deep layers with tiny H*W (7x7 / 14x14) stack several
    #             images per grid step along the matmul M axis, and add an
    #             H-split grid axis for 112x112-class layers on v7x's 64 MiB
    #             VMEM; not needed at the sizes exercised here.
    pad_left = _round_up(W + 1, 128)
    return pl.pallas_call(
        kernel,
        out_shape=(
            jax.ShapeDtypeStruct((N, C, M), store_dtype),   # raw conv output
            jax.ShapeDtypeStruct((N, C, 2), jnp.float32),   # (sum, sum-sq)
        ),
        grid=(N,),
        in_specs=in_specs,
        out_specs=(
            pl.BlockSpec((1, C, M), lambda n: (n, 0, 0)),
            pl.BlockSpec((1, C, 2), lambda n: (n, 0, 0)),
        ),
        scratch_shapes=[
            pltpu.VMEM((C, pad_left + M + W + 1), compute_dtype),  # flat pad
            pltpu.VMEM((9 * C, M), compute_dtype),                 # im2col^T
        ],
        compiler_params=pltpu.CompilerParams(
            dimension_semantics=("parallel",),
            vmem_limit_bytes=vmem_limit),
    )(*inputs)


def _fold_bn_stats(stat, gamma, beta, count):
    """(N, C, 2) per-image partial sums -> BN affine (scale, bias) as (C,1) f32."""
    s = jnp.sum(stat[:, :, 0], axis=0)
    q = jnp.sum(stat[:, :, 1], axis=0)
    mean = s / count
    var = jnp.maximum(q / count - mean * mean, 0.0)
    scale = gamma * jax.lax.rsqrt(var + EPS)
    bias = beta - mean * scale
    return scale.reshape(-1, 1), bias.reshape(-1, 1)


@functools.partial(jax.jit, static_argnames=("compute_dtype",))
def basic_block_nchw(x, w1, g1, b1, w2, g2, b2, *, compute_dtype=jnp.float32):
    """PyTorch-convention entry point: NCHW input, OIHW conv weights."""
    N, C, H, W = x.shape
    # TODO(synk): stride != 1 / downsample / Cin != Cout paths not implemented
    #             (the module's default configuration is what is reproduced).
    assert w1.shape == (C, C, 3, 3) and w2.shape == (C, C, 3, 3)
    M = H * W
    count = N * M
    vmem_limit = _vmem_limit_bytes()

    # Channel-major (N, C, H*W) view: a free reshape of the NCHW input, and the
    # layout every kernel uses, so no transposes anywhere on the data path.
    x2d = x.reshape(N, C, M)
    # OIHW -> (O, dy, dx, I) -> (O, 9*I): matches im2col row order (dy, dx, cin).
    w1t = jnp.transpose(w1, (0, 2, 3, 1)).reshape(C, 9 * C).astype(compute_dtype)
    w2t = jnp.transpose(w2, (0, 2, 3, 1)).reshape(C, 9 * C).astype(compute_dtype)

    conv1_kernel, conv2_kernel = _make_conv_kernels(H, W)
    full_vmem = pl.BlockSpec(memory_space=pltpu.MemorySpace.VMEM)  # no dbl-buffer
    act_spec = pl.BlockSpec((1, C, M), lambda n: (n, 0, 0))        # lane-dense

    # ---- pass 1: conv1 + per-image BN1 partial statistics -----------------
    y1, stat1 = _conv_pass(
        conv1_kernel,
        (x2d.astype(compute_dtype), w1t),
        [act_spec, full_vmem],
        N=N, C=C, M=M, W=W,
        store_dtype=compute_dtype, compute_dtype=compute_dtype,
        vmem_limit=vmem_limit)
    scale1, bias1 = _fold_bn_stats(stat1, g1, b1, count)

    # ---- pass 2: BN1(affine) + ReLU + conv2 + BN2 partial statistics ------
    y2, stat2 = _conv_pass(
        conv2_kernel,
        (y1, scale1, bias1, w2t),
        [act_spec, full_vmem, full_vmem, full_vmem],
        N=N, C=C, M=M, W=W,
        store_dtype=compute_dtype, compute_dtype=compute_dtype,
        vmem_limit=vmem_limit)
    scale2, bias2 = _fold_bn_stats(stat2, g2, b2, count)

    # ---- pass 3: BN2(affine) + residual add + ReLU -------------------------
    out2d = pl.pallas_call(
        bn_residual_relu_kernel,
        out_shape=jax.ShapeDtypeStruct((N, C, M), jnp.float32),
        grid=(N,),
        in_specs=[act_spec, act_spec, full_vmem, full_vmem],
        out_specs=act_spec,
        compiler_params=pltpu.CompilerParams(
            dimension_semantics=("parallel",),
            vmem_limit_bytes=vmem_limit),
    )(y2, x2d, scale2, bias2)

    return out2d.reshape(N, C, H, W)


# --------------------------------------------------------------------------
# Pure-JAX reference (matches PyTorch BasicBlock.forward, train-mode BN).
# --------------------------------------------------------------------------
def _reference_nchw(x, w1, g1, b1, w2, g2, b2):
    def conv(v, w):
        return jax.lax.conv_general_dilated(
            v, w, window_strides=(1, 1), padding=((1, 1), (1, 1)),
            dimension_numbers=("NCHW", "OIHW", "NCHW"))

    def bn(y, g, b):
        mean = jnp.mean(y, axis=(0, 2, 3), keepdims=True)
        var = jnp.mean((y - mean) ** 2, axis=(0, 2, 3), keepdims=True)
        return (y - mean) * jax.lax.rsqrt(var + EPS) * g.reshape(1, -1, 1, 1) \
            + b.reshape(1, -1, 1, 1)

    out = jax.nn.relu(bn(conv(x, w1), g1, b1))
    out = bn(conv(out, w2), g2, b2) + x
    return jax.nn.relu(out)


if __name__ == "__main__":
    # Small shapes consistent with the module defaults:
    # in_channels == out_channels, stride=1, downsample=None.
    N, C, H, W = 2, 4, 16, 16
    key = jax.random.PRNGKey(0)
    kx, kw1, kw2, kg1, kb1, kg2, kb2 = jax.random.split(key, 7)

    x = jax.random.normal(kx, (N, C, H, W), jnp.float32)
    fan = C * 9
    w1 = jax.random.normal(kw1, (C, C, 3, 3), jnp.float32) * (2.0 / fan) ** 0.5
    w2 = jax.random.normal(kw2, (C, C, 3, 3), jnp.float32) * (2.0 / fan) ** 0.5
    g1 = 1.0 + 0.1 * jax.random.normal(kg1, (C,), jnp.float32)
    b1 = 0.1 * jax.random.normal(kb1, (C,), jnp.float32)
    g2 = 1.0 + 0.1 * jax.random.normal(kg2, (C,), jnp.float32)
    b2 = 0.1 * jax.random.normal(kb2, (C,), jnp.float32)

    out = basic_block_nchw(x, w1, g1, b1, w2, g2, b2)   # f32 exact-parity path
    out = jax.block_until_ready(out)

    ref = _reference_nchw(x, w1, g1, b1, w2, g2, b2)
    assert out.shape == (N, C, H, W)
    err = float(np.max(np.abs(np.asarray(out) - np.asarray(ref))))
    assert np.allclose(np.asarray(out), np.asarray(ref), atol=2e-3, rtol=2e-3), err

    print("KERNEL_OK")
</pallas_src>

<mosaic_0001>
module attributes {stable_mosaic.version = 11 : i64} {
  func.func @conv_stats_kernel(%arg0: i32, %arg1: memref<1x4x256xf32, #tpu.memory_space<vmem>>, %arg2: memref<4x36xf32, #tpu.memory_space<vmem>>, %arg3: memref<1x4x256xf32, #tpu.memory_space<vmem>>, %arg4: memref<1x4x2xf32, #tpu.memory_space<vmem>>, %arg5: memref<4x401xf32, #tpu.memory_space<vmem>>, %arg6: memref<36x256xf32, #tpu.memory_space<vmem>>) attributes {dimension_semantics = [#tpu.dimension_semantics<parallel>], iteration_bounds = array<i64: 2>, scalar_prefetch = 0 : i64, scratch_operands = 2 : i64, tpu.core_type = #tpu.core_type<tc>, window_params = [{transform_indices = @transform_0, window_bounds = array<i64: 1, 4, 256>}, {pipeline_mode = #tpu.pipeline_mode<synchronous>, transform_indices = @transform_1, window_bounds = array<i64: 4, 36>}, {transform_indices = @transform_2, window_bounds = array<i64: 1, 4, 256>}, {transform_indices = @transform_3, window_bounds = array<i64: 1, 4, 2>}]} {
    %c0 = arith.constant 0 : index
    %c0_0 = arith.constant 0 : index
    %c0_1 = arith.constant 0 : index
    %0 = vector.load %arg1[%c0, %c0_0, %c0_1] : memref<1x4x256xf32, #tpu.memory_space<vmem>>, vector<1x4x256xf32>
    %1 = vector.shape_cast %0 : vector<1x4x256xf32> to vector<4x256xf32>
    %cst = arith.constant 0.000000e+00 : f32
    %2 = vector.broadcast %cst : f32 to vector<4x128xf32>
    %c0_2 = arith.constant 0 : index
    %c0_3 = arith.constant 0 : index
    %3 = vector.load %arg5[%c0_2, %c0_3] : memref<4x401xf32, #tpu.memory_space<vmem>>, vector<4x128xf32>
    tpu.vector_store %arg5[%c0_2, %c0_3], %2 {strides = array<i32>} : memref<4x401xf32, #tpu.memory_space<vmem>>, vector<4x128xf32>,
    %cst_4 = arith.constant 0.000000e+00 : f32
    %4 = vector.broadcast %cst_4 : f32 to vector<4x17xf32>
    %c0_5 = arith.constant 0 : index
    %c384 = arith.constant 384 : index
    %5 = vector.load %arg5[%c0_5, %c384] : memref<4x401xf32, #tpu.memory_space<vmem>>, vector<4x17xf32>
    tpu.vector_store %arg5[%c0_5, %c384], %4 {strides = array<i32>} : memref<4x401xf32, #tpu.memory_space<vmem>>, vector<4x17xf32>,
    %c0_6 = arith.constant 0 : index
    %c128 = arith.constant 128 : index
    %6 = vector.load %arg5[%c0_6, %c128] : memref<4x401xf32, #tpu.memory_space<vmem>>, vector<4x256xf32>
    tpu.vector_store %arg5[%c0_6, %c128], %1 {strides = array<i32>} : memref<4x401xf32, #tpu.memory_space<vmem>>, vector<4x256xf32>,
    %7 = tpu.iota {dimensions = array<i32: 1>} : vector<1x256xi32>
    %c16_i32 = arith.constant 16 : i32
    %c0_i32 = arith.constant 0 : i32
    %8 = arith.cmpi eq, %c16_i32, %c0_i32 : i32
    %c1_i32 = arith.constant 1 : i32
    %9 = arith.select %8, %c1_i32, %c16_i32 : i32
    %10 = vector.broadcast %9 : i32 to vector<1x256xi32>
    %11 = arith.remsi %7, %10 : vector<1x256xi32>
    %c0_i32_7 = arith.constant 0 : i32
    %12 = vector.broadcast %c0_i32_7 : i32 to vector<1x256xi32>
    %13 = arith.cmpi ne, %11, %12 : vector<1x256xi32>
    %c0_i32_8 = arith.constant 0 : i32
    %14 = vector.broadcast %c0_i32_8 : i32 to vector<1x256xi32>
    %15 = arith.cmpi slt, %11, %14 : vector<1x256xi32>
    %c0_i32_9 = arith.constant 0 : i32
    %16 = arith.cmpi slt, %9, %c0_i32_9 : i32
    %17 = vector.broadcast %16 : i1 to vector<1x256xi1>
    %18 = vector.broadcast %17 : vector<1x256xi1> to vector<1x256xi1>
    %19 = arith.xori %15, %18 : vector<1x256xi1>
    %20 = arith.andi %19, %13 : vector<1x256xi1>
    %21 = vector.broadcast %9 : i32 to vector<1x256xi32>
    %22 = arith.addi %11, %21 : vector<1x256xi32>
    %23 = arith.select %20, %22, %11 : vector<1x256xi1>, vector<1x256xi32>
    %c1_i32_10 = arith.constant 1 : i32
    %24 = vector.broadcast %c1_i32_10 : i32 to vector<1x256xi32>
    %25 = arith.cmpi sge, %23, %24 : vector<1x256xi32>
    %c14_i32 = arith.constant 14 : i32
    %26 = vector.broadcast %c14_i32 : i32 to vector<1x256xi32>
    %27 = arith.cmpi sle, %23, %26 : vector<1x256xi32>
    %c0_11 = arith.constant 0 : index
    %c111 = arith.constant 111 : index
    %28 = vector.load %arg5[%c0_11, %c111] : memref<4x401xf32, #tpu.memory_space<vmem>>, vector<4x256xf32>
    %cst_12 = arith.constant 0.000000e+00 : f32
    %29 = vector.shape_cast %25 : vector<1x256xi1> to vector<1x256xi1>
    %30 = vector.broadcast %29 : vector<1x256xi1> to vector<4x256xi1>
    %31 = vector.broadcast %cst_12 : f32 to vector<4x256xf32>
    %32 = arith.select %30, %28, %31 : vector<4x256xi1>, vector<4x256xf32>
    %c0_13 = arith.constant 0 : index
    %c0_14 = arith.constant 0 : index
    %33 = vector.load %arg6[%c0_13, %c0_14] : memref<36x256xf32, #tpu.memory_space<vmem>>, vector<4x256xf32>
    tpu.vector_store %arg6[%c0_13, %c0_14], %32 {strides = array<i32>} : memref<36x256xf32, #tpu.memory_space<vmem>>, vector<4x256xf32>,
    %c0_15 = arith.constant 0 : index
    %c112 = arith.constant 112 : index
    %34 = vector.load %arg5[%c0_15, %c112] : memref<4x401xf32, #tpu.memory_space<vmem>>, vector<4x256xf32>
    %c4 = arith.constant 4 : index
    %c0_16 = arith.constant 0 : index
    %35 = vector.load %arg6[%c4, %c0_16] : memref<36x256xf32, #tpu.memory_space<vmem>>, vector<4x256xf32>
    tpu.vector_store %arg6[%c4, %c0_16], %34 {strides = array<i32>} : memref<36x256xf32, #tpu.memory_space<vmem>>, vector<4x256xf32>,
    %c0_17 = arith.constant 0 : index
    %c113 = arith.constant 113 : index
    %36 = vector.load %arg5[%c0_17, %c113] : memref<4x401xf32, #tpu.memory_space<vmem>>, vector<4x256xf32>
    %cst_18 = arith.constant 0.000000e+00 : f32
    %37 = vector.shape_cast %27 : vector<1x256xi1> to vector<1x256xi1>
    %38 = vector.broadcast %37 : vector<1x256xi1> to vector<4x256xi1>
    %39 = vector.broadcast %cst_18 : f32 to vector<4x256xf32>
    %40 = arith.select %38, %36, %39 : vector<4x256xi1>, vector<4x256xf32>
    %c8 = arith.constant 8 : index
    %c0_19 = arith.constant 0 : index
    %41 = vector.load %arg6[%c8, %c0_19] : memref<36x256xf32, #tpu.memory_space<vmem>>, vector<4x256xf32>
    tpu.vector_store %arg6[%c8, %c0_19], %40 {strides = array<i32>} : memref<36x256xf32, #tpu.memory_space<vmem>>, vector<4x256xf32>,
    %c0_20 = arith.constant 0 : index
    %c127 = arith.constant 127 : index
    %42 = vector.load %arg5[%c0_20, %c127] : memref<4x401xf32, #tpu.memory_space<vmem>>, vector<4x256xf32>
    %cst_21 = arith.constant 0.000000e+00 : f32
    %43 = vector.shape_cast %25 : vector<1x256xi1> to vector<1x256xi1>
    %44 = vector.broadcast %43 : vector<1x256xi1> to vector<4x256xi1>
    %45 = vector.broadcast %cst_21 : f32 to vector<4x256xf32>
    %46 = arith.select %44, %42, %45 : vector<4x256xi1>, vector<4x256xf32>
    %c12 = arith.constant 12 : index
    %c0_22 = arith.constant 0 : index
    %47 = vector.load %arg6[%c12, %c0_22] : memref<36x256xf32, #tpu.memory_space<vmem>>, vector<4x256xf32>
    tpu.vector_store %arg6[%c12, %c0_22], %46 {strides = array<i32>} : memref<36x256xf32, #tpu.memory_space<vmem>>, vector<4x256xf32>,
    %c16 = arith.constant 16 : index
    %c0_23 = arith.constant 0 : index
    %48 = vector.load %arg6[%c16, %c0_23] : memref<36x256xf32, #tpu.memory_space<vmem>>, vector<4x256xf32>
    tpu.vector_store %arg6[%c16, %c0_23], %1 {strides = array<i32>} : memref<36x256xf32, #tpu.memory_space<vmem>>, vector<4x256xf32>,
    %c0_24 = arith.constant 0 : index
    %c129 = arith.constant 129 : index
    %49 = vector.load %arg5[%c0_24, %c129] : memref<4x401xf32, #tpu.memory_space<vmem>>, vector<4x256xf32>
    %cst_25 = arith.constant 0.000000e+00 : f32
    %50 = vector.shape_cast %27 : vector<1x256xi1> to vector<1x256xi1>
    %51 = vector.broadcast %50 : vector<1x256xi1> to vector<4x256xi1>
    %52 = vector.broadcast %cst_25 : f32 to vector<4x256xf32>
    %53 = arith.select %51, %49, %52 : vector<4x256xi1>, vector<4x256xf32>
    %c20 = arith.constant 20 : index
    %c0_26 = arith.constant 0 : index
    %54 = vector.load %arg6[%c20, %c0_26] : memref<36x256xf32, #tpu.memory_space<vmem>>, vector<4x256xf32>
    tpu.vector_store %arg6[%c20, %c0_26], %53 {strides = array<i32>} : memref<36x256xf32, #tpu.memory_space<vmem>>, vector<4x256xf32>,
    %c0_27 = arith.constant 0 : index
    %c143 = arith.constant 143 : index
    %55 = vector.load %arg5[%c0_27, %c143] : memref<4x401xf32, #tpu.memory_space<vmem>>, vector<4x256xf32>
    %cst_28 = arith.constant 0.000000e+00 : f32
    %56 = vector.shape_cast %25 : vector<1x256xi1> to vector<1x256xi1>
    %57 = vector.broadcast %56 : vector<1x256xi1> to vector<4x256xi1>
    %58 = vector.broadcast %cst_28 : f32 to vector<4x256xf32>
    %59 = arith.select %57, %55, %58 : vector<4x256xi1>, vector<4x256xf32>
    %c24 = arith.constant 24 : index
    %c0_29 = arith.constant 0 : index
    %60 = vector.load %arg6[%c24, %c0_29] : memref<36x256xf32, #tpu.memory_space<vmem>>, vector<4x256xf32>
    tpu.vector_store %arg6[%c24, %c0_29], %59 {strides = array<i32>} : memref<36x256xf32, #tpu.memory_space<vmem>>, vector<4x256xf32>,
    %c0_30 = arith.constant 0 : index
    %c144 = arith.constant 144 : index
    %61 = vector.load %arg5[%c0_30, %c144] : memref<4x401xf32, #tpu.memory_space<vmem>>, vector<4x256xf32>
    %c28 = arith.constant 28 : index
    %c0_31 = arith.constant 0 : index
    %62 = vector.load %arg6[%c28, %c0_31] : memref<36x256xf32, #tpu.memory_space<vmem>>, vector<4x256xf32>
    tpu.vector_store %arg6[%c28, %c0_31], %61 {strides = array<i32>} : memref<36x256xf32, #tpu.memory_space<vmem>>, vector<4x256xf32>,
    %c0_32 = arith.constant 0 : index
    %c145 = arith.constant 145 : index
    %63 = vector.load %arg5[%c0_32, %c145] : memref<4x401xf32, #tpu.memory_space<vmem>>, vector<4x256xf32>
    %cst_33 = arith.constant 0.000000e+00 : f32
    %64 = vector.shape_cast %27 : vector<1x256xi1> to vector<1x256xi1>
    %65 = vector.broadcast %64 : vector<1x256xi1> to vector<4x256xi1>
    %66 = vector.broadcast %cst_33 : f32 to vector<4x256xf32>
    %67 = arith.select %65, %63, %66 : vector<4x256xi1>, vector<4x256xf32>
    %c32 = arith.constant 32 : index
    %c0_34 = arith.constant 0 : index
    %68 = vector.load %arg6[%c32, %c0_34] : memref<36x256xf32, #tpu.memory_space<vmem>>, vector<4x256xf32>
    tpu.vector_store %arg6[%c32, %c0_34], %67 {strides = array<i32>} : memref<36x256xf32, #tpu.memory_space<vmem>>, vector<4x256xf32>,
    %c0_35 = arith.constant 0 : index
    %c0_36 = arith.constant 0 : index
    %69 = vector.load %arg2[%c0_35, %c0_36] : memref<4x36xf32, #tpu.memory_space<vmem>>, vector<4x36xf32>
    %c0_37 = arith.constant 0 : index
    %c0_38 = arith.constant 0 : index
    %70 = vector.load %arg6[%c0_37, %c0_38] : memref<36x256xf32, #tpu.memory_space<vmem>>, vector<36x256xf32>
    %cst_39 = arith.constant dense<0.000000e+00> : vector<4x256xf32>
    %71 = tpu.matmul %69, %70, %cst_39 {dimension_numbers = #tpu.dot_dimension_numbers<[1], [0], [0], [1], [0, 0, 1, 1], [], []>} : vector<4x36xf32>, vector<36x256xf32>, vector<4x256xf32> -> vector<4x256xf32>
    %c0_40 = arith.constant 0 : index
    %c0_41 = arith.constant 0 : index
    %c0_42 = arith.constant 0 : index
    %72 = vector.load %arg3[%c0_40, %c0_41, %c0_42] : memref<1x4x256xf32, #tpu.memory_space<vmem>>, vector<1x4x256xf32>
    %73 = vector.shape_cast %72 : vector<1x4x256xf32> to vector<4x256xf32>
    %74 = vector.shape_cast %71 : vector<4x256xf32> to vector<1x4x256xf32>
    tpu.vector_store %arg3[%c0_40, %c0_41, %c0_42], %74 {strides = array<i32>} : memref<1x4x256xf32, #tpu.memory_space<vmem>>, vector<1x4x256xf32>,
    %cst_43 = arith.constant dense<0.000000e+00> : vector<4xf32>
    %75 = vector.multi_reduction <add>, %71, %cst_43 [1] : vector<4x256xf32> to vector<4xf32>
    %76 = vector.shape_cast %75 : vector<4xf32> to vector<4x1xf32>
    %c0_44 = arith.constant 0 : index
    %c0_45 = arith.constant 0 : index
    %c0_46 = arith.constant 0 : index
    %77 = vector.load %arg4[%c0_44, %c0_45, %c0_46] : memref<1x4x2xf32, #tpu.memory_space<vmem>>, vector<1x4x1xf32>
    %78 = vector.shape_cast %77 : vector<1x4x1xf32> to vector<4x1xf32>
    %79 = vector.shape_cast %76 : vector<4x1xf32> to vector<1x4x1xf32>
    tpu.vector_store %arg4[%c0_44, %c0_45, %c0_46], %79 {strides = array<i32>} : memref<1x4x2xf32, #tpu.memory_space<vmem>>, vector<1x4x1xf32>,
    %80 = arith.mulf %71, %71 : vector<4x256xf32>
    %cst_47 = arith.constant dense<0.000000e+00> : vector<4xf32>
    %81 = vector.multi_reduction <add>, %80, %cst_47 [1] : vector<4x256xf32> to vector<4xf32>
    %82 = vector.shape_cast %81 : vector<4xf32> to vector<4x1xf32>
    %c0_48 = arith.constant 0 : index
    %c0_49 = arith.constant 0 : index
    %c1 = arith.constant 1 : index
    %83 = vector.load %arg4[%c0_48, %c0_49, %c1] : memref<1x4x2xf32, #tpu.memory_space<vmem>>, vector<1x4x1xf32>
    %84 = vector.shape_cast %83 : vector<1x4x1xf32> to vector<4x1xf32>
    %85 = vector.shape_cast %82 : vector<4x1xf32> to vector<1x4x1xf32>
    tpu.vector_store %arg4[%c0_48, %c0_49, %c1], %85 {strides = array<i32>} : memref<1x4x2xf32, #tpu.memory_space<vmem>>, vector<1x4x1xf32>,
    return
  }
  func.func @transform_0(%arg0: i32) -> (i32, i32, i32) {
    %c0_i32 = arith.constant 0 : i32
    %c0_i32_0 = arith.constant 0 : i32
    %c0_i32_1 = arith.constant 0 : i32
    return %arg0, %c0_i32, %c0_i32_0 : i32, i32, i32
  }
  func.func @transform_1(%arg0: i32) -> (i32, i32) {
    %c0_i32 = arith.constant 0 : i32
    %c0_i32_0 = arith.constant 0 : i32
    %c0_i32_1 = arith.constant 0 : i32
    return %c0_i32, %c0_i32_0 : i32, i32
  }
  func.func @transform_2(%arg0: i32) -> (i32, i32, i32) {
    %c0_i32 = arith.constant 0 : i32
    %c0_i32_0 = arith.constant 0 : i32
    %c0_i32_1 = arith.constant 0 : i32
    return %arg0, %c0_i32, %c0_i32_0 : i32, i32, i32
  }
  func.func @transform_3(%arg0: i32) -> (i32, i32, i32) {
    %c0_i32 = arith.constant 0 : i32
    %c0_i32_0 = arith.constant 0 : i32
    %c0_i32_1 = arith.constant 0 : i32
    return %arg0, %c0_i32, %c0_i32_0 : i32, i32, i32
  }
}

module attributes {stable_mosaic.version = 11 : i64} {
  func.func @bn_residual_relu_kernel(%arg0: i32, %arg1: memref<1x4x256xf32, #tpu.memory_space<vmem>>, %arg2: memref<1x4x256xf32, #tpu.memory_space<vmem>>, %arg3: memref<4x1xf32, #tpu.memory_space<vmem>>, %arg4: memref<4x1xf32, #tpu.memory_space<vmem>>, %arg5: memref<1x4x256xf32, #tpu.memory_space<vmem>>) attributes {dimension_semantics = [#tpu.dimension_semantics<parallel>], iteration_bounds = array<i64: 2>, scalar_prefetch = 0 : i64, scratch_operands = 0 : i64, tpu.core_type = #tpu.core_type<tc>, window_params = [{transform_indices = @transform_0, window_bounds = array<i64: 1, 4, 256>}, {transform_indices = @transform_1, window_bounds = array<i64: 1, 4, 256>}, {pipeline_mode = #tpu.pipeline_mode<synchronous>, transform_indices = @transform_2, window_bounds = array<i64: 4, 1>}, {pipeline_mode = #tpu.pipeline_mode<synchronous>, transform_indices = @transform_3, window_bounds = array<i64: 4, 1>}, {transform_indices = @transform_4, window_bounds = array<i64: 1, 4, 256>}]} {
    %c0 = arith.constant 0 : index
    %c0_0 = arith.constant 0 : index
    %c0_1 = arith.constant 0 : index
    %0 = vector.load %arg1[%c0, %c0_0, %c0_1] : memref<1x4x256xf32, #tpu.memory_space<vmem>>, vector<1x4x256xf32>
    %c0_2 = arith.constant 0 : index
    %c0_3 = arith.constant 0 : index
    %1 = vector.load %arg3[%c0_2, %c0_3] : memref<4x1xf32, #tpu.memory_space<vmem>>, vector<4x1xf32>
    %2 = vector.shape_cast %1 : vector<4x1xf32> to vector<1x4x1xf32>
    %3 = vector.broadcast %2 : vector<1x4x1xf32> to vector<1x4x256xf32>
    %4 = arith.mulf %0, %3 : vector<1x4x256xf32>
    %c0_4 = arith.constant 0 : index
    %c0_5 = arith.constant 0 : index
    %5 = vector.load %arg4[%c0_4, %c0_5] : memref<4x1xf32, #tpu.memory_space<vmem>>, vector<4x1xf32>
    %6 = vector.shape_cast %5 : vector<4x1xf32> to vector<1x4x1xf32>
    %7 = vector.broadcast %6 : vector<1x4x1xf32> to vector<1x4x256xf32>
    %8 = arith.addf %4, %7 : vector<1x4x256xf32>
    %c0_6 = arith.constant 0 : index
    %c0_7 = arith.constant 0 : index
    %c0_8 = arith.constant 0 : index
    %9 = vector.load %arg2[%c0_6, %c0_7, %c0_8] : memref<1x4x256xf32, #tpu.memory_space<vmem>>, vector<1x4x256xf32>
    %10 = arith.addf %8, %9 : vector<1x4x256xf32>
    %cst = arith.constant 0.000000e+00 : f32
    %11 = vector.broadcast %cst : f32 to vector<1x4x256xf32>
    %12 = arith.maximumf %10, %11 : vector<1x4x256xf32>
    %c0_9 = arith.constant 0 : index
    %c0_10 = arith.constant 0 : index
    %c0_11 = arith.constant 0 : index
    %13 = vector.load %arg5[%c0_9, %c0_10, %c0_11] : memref<1x4x256xf32, #tpu.memory_space<vmem>>, vector<1x4x256xf32>
    tpu.vector_store %arg5[%c0_9, %c0_10, %c0_11], %12 {strides = array<i32>} : memref<1x4x256xf32, #tpu.memory_space<vmem>>, vector<1x4x256xf32>,
    return
  }
  func.func @transform_0(%arg0: i32) -> (i32, i32, i32) {
    %c0_i32 = arith.constant 0 : i32
    %c0_i32_0 = arith.constant 0 : i32
    %c0_i32_1 = arith.constant 0 : i32
    return %arg0, %c0_i32, %c0_i32_0 : i32, i32, i32
  }
  func.func @transform_1(%arg0: i32) -> (i32, i32, i32) {
    %c0_i32 = arith.constant 0 : i32
    %c0_i32_0 = arith.constant 0 : i32
    %c0_i32_1 = arith.constant 0 : i32
    return %arg0, %c0_i32, %c0_i32_0 : i32, i32, i32
  }
  func.func @transform_2(%arg0: i32) -> (i32, i32) {
    %c0_i32 = arith.constant 0 : i32
    %c0_i32_0 = arith.constant 0 : i32
    %c0_i32_1 = arith.constant 0 : i32
    return %c0_i32, %c0_i32_0 : i32, i32
  }
  func.func @transform_3(%arg0: i32) -> (i32, i32) {
    %c0_i32 = arith.constant 0 : i32
    %c0_i32_0 = arith.constant 0 : i32
    %c0_i32_1 = arith.constant 0 : i32
    return %c0_i32, %c0_i32_0 : i32, i32
  }
  func.func @transform_4(%arg0: i32) -> (i32, i32, i32) {
    %c0_i32 = arith.constant 0 : i32
    %c0_i32_0 = arith.constant 0 : i32
    %c0_i32_1 = arith.constant 0 : i32
    return %arg0, %c0_i32, %c0_i32_0 : i32, i32, i32
  }
}

module attributes {stable_mosaic.version = 11 : i64} {
  func.func @bn_relu_conv_stats_kernel(%arg0: i32, %arg1: memref<1x4x256xf32, #tpu.memory_space<vmem>>, %arg2: memref<4x1xf32, #tpu.memory_space<vmem>>, %arg3: memref<4x1xf32, #tpu.memory_space<vmem>>, %arg4: memref<4x36xf32, #tpu.memory_space<vmem>>, %arg5: memref<1x4x256xf32, #tpu.memory_space<vmem>>, %arg6: memref<1x4x2xf32, #tpu.memory_space<vmem>>, %arg7: memref<4x401xf32, #tpu.memory_space<vmem>>, %arg8: memref<36x256xf32, #tpu.memory_space<vmem>>) attributes {dimension_semantics = [#tpu.dimension_semantics<parallel>], iteration_bounds = array<i64: 2>, scalar_prefetch = 0 : i64, scratch_operands = 2 : i64, tpu.core_type = #tpu.core_type<tc>, window_params = [{transform_indices = @transform_0, window_bounds = array<i64: 1, 4, 256>}, {pipeline_mode = #tpu.pipeline_mode<synchronous>, transform_indices = @transform_1, window_bounds = array<i64: 4, 1>}, {pipeline_mode = #tpu.pipeline_mode<synchronous>, transform_indices = @transform_2, window_bounds = array<i64: 4, 1>}, {pipeline_mode = #tpu.pipeline_mode<synchronous>, transform_indices = @transform_3, window_bounds = array<i64: 4, 36>}, {transform_indices = @transform_4, window_bounds = array<i64: 1, 4, 256>}, {transform_indices = @transform_5, window_bounds = array<i64: 1, 4, 2>}]} {
    %c0 = arith.constant 0 : index
    %c0_0 = arith.constant 0 : index
    %c0_1 = arith.constant 0 : index
    %0 = vector.load %arg1[%c0, %c0_0, %c0_1] : memref<1x4x256xf32, #tpu.memory_space<vmem>>, vector<1x4x256xf32>
    %1 = vector.shape_cast %0 : vector<1x4x256xf32> to vector<4x256xf32>
    %c0_2 = arith.constant 0 : index
    %c0_3 = arith.constant 0 : index
    %2 = vector.load %arg2[%c0_2, %c0_3] : memref<4x1xf32, #tpu.memory_space<vmem>>, vector<4x1xf32>
    %3 = vector.broadcast %2 : vector<4x1xf32> to vector<4x256xf32>
    %4 = arith.mulf %1, %3 : vector<4x256xf32>
    %c0_4 = arith.constant 0 : index
    %c0_5 = arith.constant 0 : index
    %5 = vector.load %arg3[%c0_4, %c0_5] : memref<4x1xf32, #tpu.memory_space<vmem>>, vector<4x1xf32>
    %6 = vector.broadcast %5 : vector<4x1xf32> to vector<4x256xf32>
    %7 = arith.addf %4, %6 : vector<4x256xf32>
    %cst = arith.constant 0.000000e+00 : f32
    %8 = vector.broadcast %cst : f32 to vector<4x256xf32>
    %9 = arith.maximumf %7, %8 : vector<4x256xf32>
    %cst_6 = arith.constant 0.000000e+00 : f32
    %10 = vector.broadcast %cst_6 : f32 to vector<4x128xf32>
    %c0_7 = arith.constant 0 : index
    %c0_8 = arith.constant 0 : index
    %11 = vector.load %arg7[%c0_7, %c0_8] : memref<4x401xf32, #tpu.memory_space<vmem>>, vector<4x128xf32>
    tpu.vector_store %arg7[%c0_7, %c0_8], %10 {strides = array<i32>} : memref<4x401xf32, #tpu.memory_space<vmem>>, vector<4x128xf32>,
    %cst_9 = arith.constant 0.000000e+00 : f32
    %12 = vector.broadcast %cst_9 : f32 to vector<4x17xf32>
    %c0_10 = arith.constant 0 : index
    %c384 = arith.constant 384 : index
    %13 = vector.load %arg7[%c0_10, %c384] : memref<4x401xf32, #tpu.memory_space<vmem>>, vector<4x17xf32>
    tpu.vector_store %arg7[%c0_10, %c384], %12 {strides = array<i32>} : memref<4x401xf32, #tpu.memory_space<vmem>>, vector<4x17xf32>,
    %c0_11 = arith.constant 0 : index
    %c128 = arith.constant 128 : index
    %14 = vector.load %arg7[%c0_11, %c128] : memref<4x401xf32, #tpu.memory_space<vmem>>, vector<4x256xf32>
    tpu.vector_store %arg7[%c0_11, %c128], %9 {strides = array<i32>} : memref<4x401xf32, #tpu.memory_space<vmem>>, vector<4x256xf32>,
    %15 = tpu.iota {dimensions = array<i32: 1>} : vector<1x256xi32>
    %c16_i32 = arith.constant 16 : i32
    %c0_i32 = arith.constant 0 : i32
    %16 = arith.cmpi eq, %c16_i32, %c0_i32 : i32
    %c1_i32 = arith.constant 1 : i32
    %17 = arith.select %16, %c1_i32, %c16_i32 : i32
    %18 = vector.broadcast %17 : i32 to vector<1x256xi32>
    %19 = arith.remsi %15, %18 : vector<1x256xi32>
    %c0_i32_12 = arith.constant 0 : i32
    %20 = vector.broadcast %c0_i32_12 : i32 to vector<1x256xi32>
    %21 = arith.cmpi ne, %19, %20 : vector<1x256xi32>
    %c0_i32_13 = arith.constant 0 : i32
    %22 = vector.broadcast %c0_i32_13 : i32 to vector<1x256xi32>
    %23 = arith.cmpi slt, %19, %22 : vector<1x256xi32>
    %c0_i32_14 = arith.constant 0 : i32
    %24 = arith.cmpi slt, %17, %c0_i32_14 : i32
    %25 = vector.broadcast %24 : i1 to vector<1x256xi1>
    %26 = vector.broadcast %25 : vector<1x256xi1> to vector<1x256xi1>
    %27 = arith.xori %23, %26 : vector<1x256xi1>
    %28 = arith.andi %27, %21 : vector<1x256xi1>
    %29 = vector.broadcast %17 : i32 to vector<1x256xi32>
    %30 = arith.addi %19, %29 : vector<1x256xi32>
    %31 = arith.select %28, %30, %19 : vector<1x256xi1>, vector<1x256xi32>
    %c1_i32_15 = arith.constant 1 : i32
    %32 = vector.broadcast %c1_i32_15 : i32 to vector<1x256xi32>
    %33 = arith.cmpi sge, %31, %32 : vector<1x256xi32>
    %c14_i32 = arith.constant 14 : i32
    %34 = vector.broadcast %c14_i32 : i32 to vector<1x256xi32>
    %35 = arith.cmpi sle, %31, %34 : vector<1x256xi32>
    %c0_16 = arith.constant 0 : index
    %c111 = arith.constant 111 : index
    %36 = vector.load %arg7[%c0_16, %c111] : memref<4x401xf32, #tpu.memory_space<vmem>>, vector<4x256xf32>
    %cst_17 = arith.constant 0.000000e+00 : f32
    %37 = vector.shape_cast %33 : vector<1x256xi1> to vector<1x256xi1>
    %38 = vector.broadcast %37 : vector<1x256xi1> to vector<4x256xi1>
    %39 = vector.broadcast %cst_17 : f32 to vector<4x256xf32>
    %40 = arith.select %38, %36, %39 : vector<4x256xi1>, vector<4x256xf32>
    %c0_18 = arith.constant 0 : index
    %c0_19 = arith.constant 0 : index
    %41 = vector.load %arg8[%c0_18, %c0_19] : memref<36x256xf32, #tpu.memory_space<vmem>>, vector<4x256xf32>
    tpu.vector_store %arg8[%c0_18, %c0_19], %40 {strides = array<i32>} : memref<36x256xf32, #tpu.memory_space<vmem>>, vector<4x256xf32>,
    %c0_20 = arith.constant 0 : index
    %c112 = arith.constant 112 : index
    %42 = vector.load %arg7[%c0_20, %c112] : memref<4x401xf32, #tpu.memory_space<vmem>>, vector<4x256xf32>
    %c4 = arith.constant 4 : index
    %c0_21 = arith.constant 0 : index
    %43 = vector.load %arg8[%c4, %c0_21] : memref<36x256xf32, #tpu.memory_space<vmem>>, vector<4x256xf32>
    tpu.vector_store %arg8[%c4, %c0_21], %42 {strides = array<i32>} : memref<36x256xf32, #tpu.memory_space<vmem>>, vector<4x256xf32>,
    %c0_22 = arith.constant 0 : index
    %c113 = arith.constant 113 : index
    %44 = vector.load %arg7[%c0_22, %c113] : memref<4x401xf32, #tpu.memory_space<vmem>>, vector<4x256xf32>
    %cst_23 = arith.constant 0.000000e+00 : f32
    %45 = vector.shape_cast %35 : vector<1x256xi1> to vector<1x256xi1>
    %46 = vector.broadcast %45 : vector<1x256xi1> to vector<4x256xi1>
    %47 = vector.broadcast %cst_23 : f32 to vector<4x256xf32>
    %48 = arith.select %46, %44, %47 : vector<4x256xi1>, vector<4x256xf32>
    %c8 = arith.constant 8 : index
    %c0_24 = arith.constant 0 : index
    %49 = vector.load %arg8[%c8, %c0_24] : memref<36x256xf32, #tpu.memory_space<vmem>>, vector<4x256xf32>
    tpu.vector_store %arg8[%c8, %c0_24], %48 {strides = array<i32>} : memref<36x256xf32, #tpu.memory_space<vmem>>, vector<4x256xf32>,
    %c0_25 = arith.constant 0 : index
    %c127 = arith.constant 127 : index
    %50 = vector.load %arg7[%c0_25, %c127] : memref<4x401xf32, #tpu.memory_space<vmem>>, vector<4x256xf32>
    %cst_26 = arith.constant 0.000000e+00 : f32
    %51 = vector.shape_cast %33 : vector<1x256xi1> to vector<1x256xi1>
    %52 = vector.broadcast %51 : vector<1x256xi1> to vector<4x256xi1>
    %53 = vector.broadcast %cst_26 : f32 to vector<4x256xf32>
    %54 = arith.select %52, %50, %53 : vector<4x256xi1>, vector<4x256xf32>
    %c12 = arith.constant 12 : index
    %c0_27 = arith.constant 0 : index
    %55 = vector.load %arg8[%c12, %c0_27] : memref<36x256xf32, #tpu.memory_space<vmem>>, vector<4x256xf32>
    tpu.vector_store %arg8[%c12, %c0_27], %54 {strides = array<i32>} : memref<36x256xf32, #tpu.memory_space<vmem>>, vector<4x256xf32>,
    %c16 = arith.constant 16 : index
    %c0_28 = arith.constant 0 : index
    %56 = vector.load %arg8[%c16, %c0_28] : memref<36x256xf32, #tpu.memory_space<vmem>>, vector<4x256xf32>
    tpu.vector_store %arg8[%c16, %c0_28], %9 {strides = array<i32>} : memref<36x256xf32, #tpu.memory_space<vmem>>, vector<4x256xf32>,
    %c0_29 = arith.constant 0 : index
    %c129 = arith.constant 129 : index
    %57 = vector.load %arg7[%c0_29, %c129] : memref<4x401xf32, #tpu.memory_space<vmem>>, vector<4x256xf32>
    %cst_30 = arith.constant 0.000000e+00 : f32
    %58 = vector.shape_cast %35 : vector<1x256xi1> to vector<1x256xi1>
    %59 = vector.broadcast %58 : vector<1x256xi1> to vector<4x256xi1>
    %60 = vector.broadcast %cst_30 : f32 to vector<4x256xf32>
    %61 = arith.select %59, %57, %60 : vector<4x256xi1>, vector<4x256xf32>
    %c20 = arith.constant 20 : index
    %c0_31 = arith.constant 0 : index
    %62 = vector.load %arg8[%c20, %c0_31] : memref<36x256xf32, #tpu.memory_space<vmem>>, vector<4x256xf32>
    tpu.vector_store %arg8[%c20, %c0_31], %61 {strides = array<i32>} : memref<36x256xf32, #tpu.memory_space<vmem>>, vector<4x256xf32>,
    %c0_32 = arith.constant 0 : index
    %c143 = arith.constant 143 : index
    %63 = vector.load %arg7[%c0_32, %c143] : memref<4x401xf32, #tpu.memory_space<vmem>>, vector<4x256xf32>
    %cst_33 = arith.constant 0.000000e+00 : f32
    %64 = vector.shape_cast %33 : vector<1x256xi1> to vector<1x256xi1>
    %65 = vector.broadcast %64 : vector<1x256xi1> to vector<4x256xi1>
    %66 = vector.broadcast %cst_33 : f32 to vector<4x256xf32>
    %67 = arith.select %65, %63, %66 : vector<4x256xi1>, vector<4x256xf32>
    %c24 = arith.constant 24 : index
    %c0_34 = arith.constant 0 : index
    %68 = vector.load %arg8[%c24, %c0_34] : memref<36x256xf32, #tpu.memory_space<vmem>>, vector<4x256xf32>
    tpu.vector_store %arg8[%c24, %c0_34], %67 {strides = array<i32>} : memref<36x256xf32, #tpu.memory_space<vmem>>, vector<4x256xf32>,
    %c0_35 = arith.constant 0 : index
    %c144 = arith.constant 144 : index
    %69 = vector.load %arg7[%c0_35, %c144] : memref<4x401xf32, #tpu.memory_space<vmem>>, vector<4x256xf32>
    %c28 = arith.constant 28 : index
    %c0_36 = arith.constant 0 : index
    %70 = vector.load %arg8[%c28, %c0_36] : memref<36x256xf32, #tpu.memory_space<vmem>>, vector<4x256xf32>
    tpu.vector_store %arg8[%c28, %c0_36], %69 {strides = array<i32>} : memref<36x256xf32, #tpu.memory_space<vmem>>, vector<4x256xf32>,
    %c0_37 = arith.constant 0 : index
    %c145 = arith.constant 145 : index
    %71 = vector.load %arg7[%c0_37, %c145] : memref<4x401xf32, #tpu.memory_space<vmem>>, vector<4x256xf32>
    %cst_38 = arith.constant 0.000000e+00 : f32
    %72 = vector.shape_cast %35 : vector<1x256xi1> to vector<1x256xi1>
    %73 = vector.broadcast %72 : vector<1x256xi1> to vector<4x256xi1>
    %74 = vector.broadcast %cst_38 : f32 to vector<4x256xf32>
    %75 = arith.select %73, %71, %74 : vector<4x256xi1>, vector<4x256xf32>
    %c32 = arith.constant 32 : index
    %c0_39 = arith.constant 0 : index
    %76 = vector.load %arg8[%c32, %c0_39] : memref<36x256xf32, #tpu.memory_space<vmem>>, vector<4x256xf32>
    tpu.vector_store %arg8[%c32, %c0_39], %75 {strides = array<i32>} : memref<36x256xf32, #tpu.memory_space<vmem>>, vector<4x256xf32>,
    %c0_40 = arith.constant 0 : index
    %c0_41 = arith.constant 0 : index
    %77 = vector.load %arg4[%c0_40, %c0_41] : memref<4x36xf32, #tpu.memory_space<vmem>>, vector<4x36xf32>
    %c0_42 = arith.constant 0 : index
    %c0_43 = arith.constant 0 : index
    %78 = vector.load %arg8[%c0_42, %c0_43] : memref<36x256xf32, #tpu.memory_space<vmem>>, vector<36x256xf32>
    %cst_44 = arith.constant dense<0.000000e+00> : vector<4x256xf32>
    %79 = tpu.matmul %77, %78, %cst_44 {dimension_numbers = #tpu.dot_dimension_numbers<[1], [0], [0], [1], [0, 0, 1, 1], [], []>} : vector<4x36xf32>, vector<36x256xf32>, vector<4x256xf32> -> vector<4x256xf32>
    %c0_45 = arith.constant 0 : index
    %c0_46 = arith.constant 0 : index
    %c0_47 = arith.constant 0 : index
    %80 = vector.load %arg5[%c0_45, %c0_46, %c0_47] : memref<1x4x256xf32, #tpu.memory_space<vmem>>, vector<1x4x256xf32>
    %81 = vector.shape_cast %80 : vector<1x4x256xf32> to vector<4x256xf32>
    %82 = vector.shape_cast %79 : vector<4x256xf32> to vector<1x4x256xf32>
    tpu.vector_store %arg5[%c0_45, %c0_46, %c0_47], %82 {strides = array<i32>} : memref<1x4x256xf32, #tpu.memory_space<vmem>>, vector<1x4x256xf32>,
    %cst_48 = arith.constant dense<0.000000e+00> : vector<4xf32>
    %83 = vector.multi_reduction <add>, %79, %cst_48 [1] : vector<4x256xf32> to vector<4xf32>
    %84 = vector.shape_cast %83 : vector<4xf32> to vector<4x1xf32>
    %c0_49 = arith.constant 0 : index
    %c0_50 = arith.constant 0 : index
    %c0_51 = arith.constant 0 : index
    %85 = vector.load %arg6[%c0_49, %c0_50, %c0_51] : memref<1x4x2xf32, #tpu.memory_space<vmem>>, vector<1x4x1xf32>
    %86 = vector.shape_cast %85 : vector<1x4x1xf32> to vector<4x1xf32>
    %87 = vector.shape_cast %84 : vector<4x1xf32> to vector<1x4x1xf32>
    tpu.vector_store %arg6[%c0_49, %c0_50, %c0_51], %87 {strides = array<i32>} : memref<1x4x2xf32, #tpu.memory_space<vmem>>, vector<1x4x1xf32>,
    %88 = arith.mulf %79, %79 : vector<4x256xf32>
    %cst_52 = arith.constant dense<0.000000e+00> : vector<4xf32>
    %89 = vector.multi_reduction <add>, %88, %cst_52 [1] : vector<4x256xf32> to vector<4xf32>
    %90 = vector.shape_cast %89 : vector<4xf32> to vector<4x1xf32>
    %c0_53 = arith.constant 0 : index
    %c0_54 = arith.constant 0 : index
    %c1 = arith.constant 1 : index
    %91 = vector.load %arg6[%c0_53, %c0_54, %c1] : memref<1x4x2xf32, #tpu.memory_space<vmem>>, vector<1x4x1xf32>
    %92 = vector.shape_cast %91 : vector<1x4x1xf32> to vector<4x1xf32>
    %93 = vector.shape_cast %90 : vector<4x1xf32> to vector<1x4x1xf32>
    tpu.vector_store %arg6[%c0_53, %c0_54, %c1], %93 {strides = array<i32>} : memref<1x4x2xf32, #tpu.memory_space<vmem>>, vector<1x4x1xf32>,
    return
  }
  func.func @transform_0(%arg0: i32) -> (i32, i32, i32) {
    %c0_i32 = arith.constant 0 : i32
    %c0_i32_0 = arith.constant 0 : i32
    %c0_i32_1 = arith.constant 0 : i32
    return %arg0, %c0_i32, %c0_i32_0 : i32, i32, i32
  }
  func.func @transform_1(%arg0: i32) -> (i32, i32) {
    %c0_i32 = arith.constant 0 : i32
    %c0_i32_0 = arith.constant 0 : i32
    %c0_i32_1 = arith.constant 0 : i32
    return %c0_i32, %c0_i32_0 : i32, i32
  }
  func.func @transform_2(%arg0: i32) -> (i32, i32) {
    %c0_i32 = arith.constant 0 : i32
    %c0_i32_0 = arith.constant 0 : i32
    %c0_i32_1 = arith.constant 0 : i32
    return %c0_i32, %c0_i32_0 : i32, i32
  }
  func.func @transform_3(%arg0: i32) -> (i32, i32) {
    %c0_i32 = arith.constant 0 : i32
    %c0_i32_0 = arith.constant 0 : i32
    %c0_i32_1 = arith.constant 0 : i32
    return %c0_i32, %c0_i32_0 : i32, i32
  }
  func.func @transform_4(%arg0: i32) -> (i32, i32, i32) {
    %c0_i32 = arith.constant 0 : i32
    %c0_i32_0 = arith.constant 0 : i32
    %c0_i32_1 = arith.constant 0 : i32
    return %arg0, %c0_i32, %c0_i32_0 : i32, i32, i32
  }
  func.func @transform_5(%arg0: i32) -> (i32, i32, i32) {
    %c0_i32 = arith.constant 0 : i32
    %c0_i32_0 = arith.constant 0 : i32
    %c0_i32_1 = arith.constant 0 : i32
    return %arg0, %c0_i32, %c0_i32_0 : i32, i32, i32
  }
}

</mosaic_0001>

<bundles_post_ra>
// kernel: basic_block_nchw.3
= control target key start
LH: loop header
LB: loop body
LE: loop exit
PB: predicated region body
PF: predicated region fallthrough
CT: control target
= control target key end

     0   :  { %s685_s12 = smov 0   ;;  %s766_s0 = inlined_call_operand.vmem [shape: f32[2,4,256], index: 0, kind: input, shape index: {}]   ;;  %s767_s1 = inlined_call_operand.vmem [shape: f32[4,36], index: 1, kind: input, shape index: {}]   ;;  %s768_s2 = inlined_call_operand.vmem [shape: f32[2,4,256], index: 2, kind: output, shape index: {0}]   ;;  %s769_s3 = inlined_call_operand.vmem [shape: f32[2,4,2], index: 3, kind: output, shape index: {1}]  }
   0x1 LB: > { %s601_s13 = sadd.s32 4294967295, %s654_s12   ;;  %p605_p0 = scmp.ge.s32.totalorder %s654_s12, 1  ;;  %s654_s12 = sphi %s685_s12, %s14_s12  }
   0x2   : > { %p140_p1 = scmp.lt.s32.totalorder %s654_s12, 3 }
   0x4   : > { %p141_p2 = pnand %p605_p0, %p140_p1 }
   0x5   : > { %p168_p3 = scmp.lt.s32.totalorder (!%p141_p2), %s601_s13, 1  ;;  %vm184_vm0 = vcmask (!%p141_p2), 134144   ;;  %v656_v0 = vmov (!%p141_p2), 0.0   ;;  %s657_s18 = smov (!%p141_p2), 1   ;;  %v187_v15 = vlaneseq (!%p141_p2)  ;;  %vm233_vm1 = vcmask (!%p141_p2), 138240  }
   0x6   : > { %144 = sbr.rel (%p141_p2) target bundleno = 557 (0x22d), region = 28  ;;  %183 = vst [vmem:[#allocation2] sm:$0xf] (!%p141_p2), %v656_v0  ;;  %185 = vst.msk [vmem:[#allocation2 + $0xc] sm:$0xf] (!%p141_p2), %vm184_vm0, %v656_v0  ;;  %487 = vmatprep.mubr.f32.mxu0 (!%p141_p2), %v656_v0  ;;  %s658_s19 = smov (!%p141_p2), 17  }
   0x7   : > { %s659_s20 = smov (!%p141_p2), 15   ;;  %s660_s21 = smov (!%p141_p2), 16   ;;  %v188_v16 = vand.u32 (!%p141_p2), 127, %v187_v15  ;;  %vm276_vm4 = vcmask (!%p141_p2), 121856   ;;  %vm296_vm6 = vcmask (!%p141_p2), 7168   ;;  %vm254_vm7 = vcmask (!%p141_p2), 130048  }
   0x8   : > { %s661_s22 = smov (!%p141_p2), 127   ;;  %s662_s23 = smov (!%p141_p2), 113   ;;  %vm327_vm9 = vcmask (!%p141_p2), 1039360   ;;  %vm353_vm10 = vcmask (!%p141_p2), 924672   ;;  %vm374_vm11 = vcmask (!%p141_p2), 916480   ;;  %vm392_vm12 = vcmask (!%p141_p2), 908288  }
   0x9   : > { %s663_s24 = smov (!%p141_p2), 112   ;;  %s664_s25 = smov (!%p141_p2), 111   ;;  %v189_v17 = vadd.s32 (!%p141_p2), 128, %v188_v16  ;;  %v194_v20 = vand.u32 (!%p141_p2), 15, %v188_v16  ;;  %vm416_vm13 = vcmask (!%p141_p2), 1043456   ;;  %vm412_vm14 = vcmask (!%p141_p2), 293888  }
   0xa   : > { %vm504_vm15 = vcmask (!%p141_p2), 3072   ;;  %vm513_vm0 = vcmask (!%p141_p2), 11272  }
   0xb   : > { %v201_v21 = vand.u32 (!%p141_p2), 15, %v189_v17  ;;  %vm701_vm2 = vcmp.ge.s32.totalorder (!%p141_p2), %v194_v20, 1  ;;  %vm725_vm8 = vcmp.le.s32.totalorder (!%p141_p2), %v194_v20, 14 }
   0xd   : > { %s779_s13 = smov (!%p168_p3, %s601_s13), 1  ;;  %v317_v10 = vld [vmem:[#allocation2 + $0xc] sm:$0xf]  ;;  %vm705_vm3 = vcmp.ge.s32.totalorder %v201_v21, 1  ;;  %vm713_vm5 = vcmp.le.s32.totalorder %v201_v21, 14 }
   0xe   : > { %s616_s14 = sshll.u32 %s779_s13, 3  ;;  %v343_v11 = vld [vmem:[#allocation2 + $0xc] sm:$0xf]  ;;  %s610_s4 = sshll.u32 %s779_s13, 2 }
   0xf   : > { %s172_s17 = scalar_lea.vmem %s766_s0, %s616_s14  ;;  %v647_v12 = vld [vmem:[#allocation2 + $0xc] ss:$0 sps:$4 sm:$0xff]   ;;  %s177_s30 = scalar_lea.vmem %s768_s2, %s616_s14 }
  0x10   : > { %v182_v1 = vld [vmem:[%s172_s17] sm:$0xff]  ;;  %v382_v14 = vld [vmem:[#allocation2 + $0xc] sm:$0xf]  ;;  %s181_s7 = scalar_lea.vmem %s769_s3, %s610_s4 }
  0x11   : > { %186 = vst [vmem:[#allocation2 + $0x4] sm:$0xff] %v182_v1  ;;  %v312_v2 = vcombine.high %v182_v1, %v182_v1  ;;  %314 = vst [vmem:[#allocation3 + $0x20] sm:$0xf] %v182_v1  ;;  %v366_v13 = vcombine.low %v182_v1, %v182_v1 }
  0x13   : > { %315 = vst [vmem:[#allocation3 + $0x28] sm:$0xf] %v312_v2 }
  0x18   : > { %v286_v3 = vld [vmem:[#allocation2 + $0x8] sm:$0xf]  ;;  %v285_v4 = vld [vmem:[#allocation2] sm:$0xff] }
  0x19   : > { %294 = vrot.lane.b32.xlu0 %v286_v3, %s657_s18  ;;  %290 = vrot.lane.b32.xlu1 %v285_v4, %s657_s18  ;;  %v219_v5 = vld [vmem:[#allocation2 + $0x8] sm:$0xf]  ;;  %v289_v6 = vcombine.high %v285_v4, %v285_v4  ;;  %v246_v9 = vcombine.low %v285_v4, %v285_v4 }
  0x1a   : > { %v262_v7 = vld [vmem:[#allocation2 + $0x8] sm:$0xf] }
  0x1b   : > { %v646_v8 = vld [vmem:[#allocation2 + $0x8] ss:$0 sps:$4 sm:$0xff]  }
  0x1d   : > { %231 = vrot.lane.b32.xlu0 %v219_v5, %s658_s19  ;;  %227 = vrot.lane.b32.xlu1 %v285_v4, %s658_s19 }
  0x21   : > { %274 = vrot.lane.b32.xlu0 %v262_v7, %s659_s20  ;;  %229 = vrot.lane.b32.xlu1 %v289_v6, %s658_s19 }
  0x25   : > { %250 = vrot.lane.b32.xlu0 %v285_v4, %s660_s21  ;;  %272 = vrot.lane.b32.xlu1 %v289_v6, %s659_s20 }
  0x29   : > { %292 = vrot.lane.b32.xlu0 %v289_v6, %s657_s18  ;;  %252 = vrot.lane.b32.xlu1 %v646_v8, %s660_s21 }
  0x2d   : > { %270 = vrot.lane.b32.xlu0 %v285_v4, %s659_s20  ;;  %248 = vrot.lane.b32.xlu1 %v246_v9, %s660_s21 }
  0x31   : > { %323 = vrot.lane.b32.xlu0 %v312_v2, %s661_s22  ;;  %325 = vrot.lane.b32.xlu1 %v317_v10, %s661_s22 }
  0x35   : > { %321 = vrot.lane.b32.xlu0 %v182_v1, %s661_s22  ;;  %349 = vrot.lane.b32.xlu1 %v312_v2, %s662_s23 }
  0x39   : > { %351 = vrot.lane.b32.xlu0 %v343_v11, %s662_s23  ;;  %347 = vrot.lane.b32.xlu1 %v182_v1, %s662_s23 }
  0x3d   : > { %370 = vrot.lane.b32.xlu0 %v182_v1, %s663_s24  ;;  %372 = vrot.lane.b32.xlu1 %v647_v12, %s663_s24 }
  0x41   : > { %368 = vrot.lane.b32.xlu0 %v366_v13, %s663_s24  ;;  %388 = vrot.lane.b32.xlu1 %v312_v2, %s664_s25 }
  0x45   : > { %390 = vrot.lane.b32.xlu0 %v382_v14, %s664_s25  ;;  %386 = vrot.lane.b32.xlu1 %v182_v1, %s664_s25 }
  0x8b   : > { %v295_v18 = vpop.permute.xlu0 %294  ;;  %v291_v19 = vpop.permute.xlu1 %290 }
  0x8f   : > { %v232_v22 = vpop.permute.xlu0 %231  ;;  %v228_v23 = vpop.permute.xlu1 %227 }
  0x93   : > { %v275_v26 = vpop.permute.xlu0 %274  ;;  %v230_v27 = vpop.permute.xlu1 %229 }
  0x94   : > { %v234_v28 = vsel %vm233_vm1, %v228_v23, %v230_v27  ;;  %v235_v29 = vsel %vm233_vm1, %v230_v27, %v232_v22 }
  0x95   : > { %v238_v30 = vsel %vm701_vm2, %v234_v28, 0.0  ;;  %v239_v31 = vsel %vm705_vm3, %v235_v29, 0.0  ;;  %v401_v28 = vld [vmem:[%s767_s1] sm:$0xf] }
  0x96   : > { %240 = vst [vmem:[#allocation3] sm:$0xf] %v238_v30  ;;  %241 = vst [vmem:[#allocation3 + $0x8] sm:$0xf] %v239_v31 }
  0x97   : > { %v251_v33 = vpop.permute.xlu0 %250  ;;  %v273_v34 = vpop.permute.xlu1 %272 }
  0x98   : > { %v278_v35 = vsel %vm276_vm4, %v273_v34, %v275_v26 }
  0x99   : > { %v282_v36 = vsel %vm713_vm5, %v278_v35, 0.0 }
  0x9a   : > { %284 = vst [vmem:[#allocation3 + $0x18] sm:$0xf] %v282_v36 }
  0x9b   : > { %v293_v37 = vpop.permute.xlu0 %292  ;;  %v253_v38 = vpop.permute.xlu1 %252 }
  0x9c   : > { %v297_v39 = vsel %vm296_vm6, %v291_v19, %v293_v37  ;;  %v298_v40 = vsel %vm296_vm6, %v293_v37, %v295_v18  ;;  %v256_v41 = vsel %vm254_vm7, %v251_v33, %v253_v38 }
  0x9d   : > { %v301_v42 = vsel %vm701_vm2, %v297_v39, 0.0  ;;  %v302_v43 = vsel %vm705_vm3, %v298_v40, 0.0  ;;  %260 = vst [vmem:[#allocation3 + $0x8] sm:$0xf0] %v256_v41 }
  0x9e   : > { %v305_v44 = vrot.slane %v301_v42, 4  ;;  %v306_v45 = vrot.slane %v302_v43, 4 }
  0x9f   : > { %v271_v47 = vpop.permute.xlu0 %270  ;;  %v249_v48 = vpop.permute.xlu1 %248 }
  0xa0   : > { %309 = vst [vmem:[#allocation3 + $0x10] sm:$0xf0] %v305_v44  ;;  %310 = vst [vmem:[#allocation3 + $0x18] sm:$0xf0] %v306_v45  ;;  %v277_v49 = vsel %vm276_vm4, %v271_v47, %v273_v34  ;;  %v255_v50 = vsel %vm254_vm7, %v249_v48, %v251_v33 }
  0xa1   : > { %v281_v51 = vsel %vm725_vm8, %v277_v49, 0.0  ;;  %259 = vst [vmem:[#allocation3] sm:$0xf0] %v255_v50 }
  0xa2   : > { %283 = vst [vmem:[#allocation3 + $0x10] sm:$0xf] %v281_v51 }
  0xa3   : > { %v324_v52 = vpop.permute.xlu0 %323  ;;  %v326_v53 = vpop.permute.xlu1 %325 }
  0xa4   : > { %v329_v54 = vsel %vm327_vm9, %v324_v52, %v326_v53  ;;  %v403_v59 = vld [vmem:[#allocation3 + $0x8] sm:$0xff] }
  0xa5   : > { %v333_v55 = vsel %vm713_vm5, %v329_v54, 0.0 }
  0xa6   : > { %v337_v56 = vrot.slane %v333_v55, 4 }
  0xa7   : > { %v322_v57 = vpop.permute.xlu0 %321  ;;  %v350_v58 = vpop.permute.xlu1 %349  ;;  %v405_v60 = vld [vmem:[#allocation3 + $0x18] sm:$0xff] }
  0xa8   : > { %341 = vst [vmem:[#allocation3 + $0x28] sm:$0xf0] %v337_v56  ;;  %v328_v61 = vsel %vm327_vm9, %v322_v57, %v324_v52  ;;  %v618_v62 = vpack.c.bf16 %v405_v60, %v403_v59  ;;  %v402_v63 = vld [vmem:[#allocation3] sm:$0xff] }
  0xa9   : > { %v332_v0 = vsel %vm725_vm8, %v328_v61, 0.0  ;;  %v404_v1 = vld [vmem:[#allocation3 + $0x10] sm:$0xff] }
  0xaa   : > { %v336_v2 = vrot.slane %v332_v0, 4  ;;  %619 = vmatprep.subr.bf16.mxu0 %v618_v62  ;;  %v620_v3 = vpack.c.bf16 %v404_v1, %v402_v63 }
  0xab   : > { %v352_v4 = vpop.permute.xlu0 %351  ;;  %v348_v5 = vpop.permute.xlu1 %347 }
  0xac   : > { %340 = vst [vmem:[#allocation3 + $0x20] sm:$0xf0] %v336_v2  ;;  %v355_v6 = vsel %vm353_vm10, %v350_v58, %v352_v4  ;;  %v354_v7 = vsel %vm353_vm10, %v348_v5, %v350_v58  ;;  %621 = vmatpush1.bf16.msra.mxu0 %v620_v3 }
  0xad   : > { %v359_v8 = vsel %vm705_vm3, %v355_v6, 0.0  ;;  %v358_v9 = vsel %vm701_vm2, %v354_v7, 0.0 }
  0xae   : > { %361 = vst [vmem:[#allocation3 + $0x38] sm:$0xf] %v359_v8  ;;  %360 = vst [vmem:[#allocation3 + $0x30] sm:$0xf] %v358_v9 }
  0xaf   : > { %v371_v10 = vpop.permute.xlu0 %370  ;;  %v373_v11 = vpop.permute.xlu1 %372  ;;  %v407_v20 = vld [vmem:[#allocation3 + $0x28] sm:$0xff] }
  0xb0   : > { %v376_v12 = vsel %vm374_vm11, %v371_v10, %v373_v11 }
  0xb1   : > { %380 = vst [vmem:[#allocation3 + $0x38] sm:$0xf0] %v376_v12 }
  0xb3   : > { %v369_v13 = vpop.permute.xlu0 %368  ;;  %v389_v14 = vpop.permute.xlu1 %388  ;;  %v406_v25 = vld [vmem:[#allocation3 + $0x20] sm:$0xff] }
  0xb4   : > { %v375_v15 = vsel %vm374_vm11, %v369_v13, %v371_v10 }
  0xb5   : > { %379 = vst [vmem:[#allocation3 + $0x30] sm:$0xf0] %v375_v15 }
  0xb7   : > { %v391_v16 = vpop.permute.xlu0 %390  ;;  %v387_v17 = vpop.permute.xlu1 %386 }
  0xb8   : > { %v394_v18 = vsel %vm392_vm12, %v389_v14, %v391_v16  ;;  %v393_v19 = vsel %vm392_vm12, %v387_v17, %v389_v14  ;;  %v409_v21 = vld [vmem:[#allocation3 + $0x38] sm:$0xff] }
  0xb9   : > { %v398_v22 = vsel %vm713_vm5, %v394_v18, 0.0  ;;  %v397_v23 = vsel %vm725_vm8, %v393_v19, 0.0  ;;  %v622_v24 = vpack.c.bf16 %v409_v21, %v407_v20 }
  0xba   : > { %400 = vst [vmem:[#allocation3 + $0x48] sm:$0xf] %v398_v22  ;;  %399 = vst [vmem:[#allocation3 + $0x40] sm:$0xf] %v397_v23 }
  0xbb   : > { %623 = vmatprep.subr.bf16.mxu0 %v622_v24 }
  0xbc   : > { %v408_v26 = vld [vmem:[#allocation3 + $0x30] sm:$0xff] }
  0xbd   : > { %v624_v27 = vpack.c.bf16 %v408_v26, %v406_v25 }
  0xbf   : > { %625 = vmatpush1.bf16.msra.mxu0 %v624_v27 }
  0xc1   : > { %v411_v29 = vld [vmem:[#allocation3 + $0x48] sm:$0xf]  ;;  %v410_v30 = vld [vmem:[#allocation3 + $0x40] sm:$0xf] }
  0xc2   : > { %611 = vmatprep.subr.msk.mxu0 %vm416_vm13, %v411_v29 }
  0xc3   : > { %612 = vmatpush1.msk.msra.mxu0 %vm416_vm13, %v410_v30 }
  0xc4   : > { %613 = vmatmul.mubr.msk.f32.vlgmr.msra.gmra.mrb[0].mxu0 %vm412_vm14, %v401_v28 }
 0x197   : > { %v489_v31 = vpop.f32.mrb[0].mxu0 }
 0x198   : > { %v506_v32 = vmul.f32 %v489_v31, %v489_v31  ;;  %v491_v33 = vpop.f32.mrb[1].mxu0  ;;  %v499_v34 = vsel %vm416_vm13, %v489_v31, 0.0 }
 0x199   : > { %v496_v35 = vcombine.low %v489_v31, %v491_v33  ;;  %v500_v36 = vsel %vm416_vm13, %v491_v33, 0.0  ;;  %v507_v37 = vmul.f32 %v491_v33, %v491_v33 }
 0x19a   : > { %v501_v38 = vadd.f32 %v500_v36, %v499_v34  ;;  %v508_v39 = vsel %vm416_vm13, %v506_v32, 0.0 }
 0x19b   : > { %498 = vst [vmem:[%s177_s30] sm:$0xff] %v496_v35  ;;  %v509_v40 = vsel %vm416_vm13, %v507_v37, 0.0 }
 0x19c   : > { %502 = vadd.xlane.f32.xlu0 %v501_v38  ;;  %v510_v41 = vadd.f32 %v509_v40, %v508_v39 }
 0x19e   : > { %511 = vadd.xlane.f32.xlu1 %v510_v41 }
 0x229   : > { %v503_v42 = vpop.xlane.xlu0 %502 }
 0x22a   : > { %505 = vst.msk [vmem:[%s181_s7] sm:$0xf] %vm504_vm15, %v503_v42 }
 0x22b   : > { %v512_v43 = vpop.xlane.xlu1 %511 }
 0x22c   : > { %514 = vst.msk [vmem:[%s181_s7] sm:$0xf] %vm513_vm0, %v512_v43 }
 0x22d PF: > { %s14_s12 = sadd.s32 1, %s654_s12  }
 0x22e   : > { %p11_p4 = scmp.ge.s32.totalorder %s14_s12, 4  }
 0x230   :  { %13 = sbr.rel (!%p11_p4) target bundleno = 1 (0x1), region = 70 }

// kernel: basic_block_nchw.5
= control target key start
LH: loop header
LB: loop body
LE: loop exit
PB: predicated region body
PF: predicated region fallthrough
CT: control target
= control target key end

     0   :  { %s380_s15 = smov 0   ;;  %s406_s0 = inlined_call_operand.vmem [shape: f32[2,4,256], index: 0, kind: input, shape index: {}]   ;;  %s407_s1 = inlined_call_operand.vmem [shape: f32[2,4,256], index: 1, kind: input, shape index: {}]   ;;  %s408_s2 = inlined_call_operand.vmem [shape: f32[4,1], index: 2, kind: input, shape index: {}]   ;;  %s409_s3 = inlined_call_operand.vmem [shape: f32[4,1], index: 3, kind: input, shape index: {}]   ;;  %s410_s4 = inlined_call_operand.vmem [shape: f32[2,4,256], index: 4, kind: output, shape index: {}]  }
   0x1 LB: > { %s318_s16 = sadd.s32 4294967295, %s351_s15   ;;  %p322_p0 = scmp.ge.s32.totalorder %s351_s15, 1  ;;  %s351_s15 = sphi %s380_s15, %s14_s15  }
   0x2   : > { %p172_p1 = scmp.lt.s32.totalorder %s351_s15, 3 }
   0x4   : > { %p173_p2 = pnand %p322_p0, %p172_p1 }
   0x5   : > { %v219_v0 = vld [vmem:[%s408_s2] sm:$0xf] (!%p173_p2)  ;;  %v353_v1 = vmov (!%p173_p2), 0   ;;  %p203_p3 = scmp.lt.s32.totalorder (!%p173_p2), %s318_s16, 1  ;;  %v354_v3 = vmov (!%p173_p2), 839922192   ;;  %v227_v5 = vlaneseq (!%p173_p2) }
   0x6   : > { %176 = sbr.rel (%p173_p2) target bundleno = 148 (0x94), region = 36  ;;  %344 = vset.pattern.permute.xlu0 (!%p173_p2), %v353_v1  ;;  %v233_v2 = vld [vmem:[%s409_s3] sm:$0xf] (!%p173_p2)  ;;  %v225_v4 = vunpack.c.l.s4 (!%p173_p2), %v354_v3 }
   0x7   : > { %222 = vperm.xlu0 (!%p173_p2), %344, %v219_v0   ;;  %v228_v7 = vshrl.u32 (!%p173_p2), %v227_v5, 7 }
   0x8   : > { %v226_v6 = vunpack.c.0.s8 (!%p173_p2), %v225_v4 }
   0xa   : > { %v229_v8 = vsub.s32 (!%p173_p2), %v226_v6, %v228_v7 }
   0xb   : > { %236 = vperm.xlu0 (!%p173_p2), %344, %v233_v2  }
   0xd   : > { %s412_s16 = smov (!%p203_p3, %s318_s16), 1 }
   0xe   : > { %s331_s21 = sshll.u32 %s412_s16, 3 }
   0xf   : > { %s207_s24 = scalar_lea.vmem %s406_s0, %s331_s21  ;;  %s212_s27 = scalar_lea.vmem %s407_s1, %s331_s21 }
  0x10   : > { %v218_v11 = vld [vmem:[%s207_s24] sm:$0xff]  ;;  %s217_s30 = scalar_lea.vmem %s410_s4, %s331_s21 }
  0x11   : > { %v247_v15 = vld [vmem:[%s212_s27] sm:$0xff] }
  0x86   : > { %v223_v9 = vpop.permute.xlu0 %222 }
  0x87   : > { %v230_v10 = vrot.slane %v223_v9, %v229_v8 }
  0x89   : > { %v232_v13 = vmul.f32 %v230_v10, %v218_v11 }
  0x8a   : > { %v237_v12 = vpop.permute.xlu0 %236 }
  0x8b   : > { %v244_v14 = vrot.slane %v237_v12, %v229_v8 }
  0x8d   : > { %v246_v16 = vadd.f32 %v244_v14, %v232_v13 }
  0x8f   : > { %v248_v17 = vadd.f32 %v247_v15, %v246_v16 }
  0x91   : > { %v249_v18 = vmax.f32 %v248_v17, 0.0 }
  0x93   : > { %250 = vst [vmem:[%s217_s30] sm:$0xff] %v249_v18 }
  0x94 PF: > { %s14_s15 = sadd.s32 1, %s351_s15  }
  0x95   : > { %p11_p4 = scmp.ge.s32.totalorder %s14_s15, 4  }
  0x97   :  { %13 = sbr.rel (!%p11_p4) target bundleno = 1 (0x1), region = 69 }

// kernel: basic_block_nchw.4
= control target key start
LH: loop header
LB: loop body
LE: loop exit
PB: predicated region body
PF: predicated region fallthrough
CT: control target
= control target key end

     0   :  { %s782_s18 = smov 0   ;;  %s879_s0 = inlined_call_operand.vmem [shape: f32[2,4,256], index: 0, kind: input, shape index: {}]   ;;  %s880_s1 = inlined_call_operand.vmem [shape: f32[4,1], index: 1, kind: input, shape index: {}]   ;;  %s881_s2 = inlined_call_operand.vmem [shape: f32[4,1], index: 2, kind: input, shape index: {}]   ;;  %s882_s3 = inlined_call_operand.vmem [shape: f32[4,36], index: 3, kind: input, shape index: {}]   ;;  %s883_s4 = inlined_call_operand.vmem [shape: f32[2,4,256], index: 4, kind: output, shape index: {0}]   ;;  %s884_s5 = inlined_call_operand.vmem [shape: f32[2,4,2], index: 5, kind: output, shape index: {1}]  }
   0x1 LB: > { %s684_s19 = sadd.s32 4294967295, %s739_s18   ;;  %p688_p0 = scmp.ge.s32.totalorder %s739_s18, 1  ;;  %s739_s18 = sphi %s782_s18, %s16_s18  }
   0x2   : > { %p190_p1 = scmp.lt.s32.totalorder %s739_s18, 3 }
   0x4   : > { %p191_p2 = pnand %p688_p0, %p190_p1 }
   0x5   : > { %v237_v0 = vld [vmem:[%s880_s1] sm:$0xf] (!%p191_p2)  ;;  %v741_v1 = vmov (!%p191_p2), 0   ;;  %vm267_vm0 = vcmask (!%p191_p2), 134144   ;;  %v742_v3 = vmov (!%p191_p2), 0.0   ;;  %s743_s24 = smov (!%p191_p2), 127   ;;  %v245_v9 = vlaneseq (!%p191_p2) }
   0x6   : > { %194 = sbr.rel (%p191_p2) target bundleno = 680 (0x2a8), region = 36  ;;  %728 = vset.pattern.permute.xlu0 (!%p191_p2), %v741_v1  ;;  %v251_v2 = vld [vmem:[%s881_s2] sm:$0xf] (!%p191_p2)  ;;  %268 = vst.msk [vmem:[#allocation2 + $0xc] sm:$0xf] (!%p191_p2), %vm267_vm0, %v742_v3  ;;  %570 = vmatprep.mubr.f32.mxu0 (!%p191_p2), %v742_v3  ;;  %s744_s25 = smov (!%p191_p2), 113  }
   0x7   : > { %240 = vperm.xlu0 (!%p191_p2), %728, %v237_v0   ;;  %266 = vst [vmem:[#allocation2] sm:$0xf] (!%p191_p2), %v742_v3  ;;  %s745_s26 = smov (!%p191_p2), 112   ;;  %p222_p3 = scmp.lt.s32.totalorder (!%p191_p2), %s684_s19, 1  ;;  %v746_v7 = vmov (!%p191_p2), 839922192  }
   0x8   : > { %v243_v8 = vunpack.c.l.s4 (!%p191_p2), %v746_v7  ;;  %v246_v11 = vshrl.u32 (!%p191_p2), %v245_v9, 7  ;;  %s747_s6 = smov (!%p191_p2), 1   ;;  %s748_s7 = smov (!%p191_p2), 17   ;;  %v271_v34 = vand.u32 (!%p191_p2), 127, %v245_v9  ;;  %vm379_vm1 = vcmask (!%p191_p2), 7168  }
   0x9   : > { %s749_s8 = smov (!%p191_p2), 15   ;;  %s750_s9 = smov (!%p191_p2), 16   ;;  %vm316_vm4 = vcmask (!%p191_p2), 138240   ;;  %vm359_vm5 = vcmask (!%p191_p2), 121856   ;;  %vm457_vm8 = vcmask (!%p191_p2), 916480   ;;  %vm337_vm9 = vcmask (!%p191_p2), 130048  }
   0xa   : > { %v244_v10 = vunpack.c.0.s8 (!%p191_p2), %v243_v8  ;;  %s751_s10 = smov (!%p191_p2), 111   ;;  %v272_v37 = vadd.s32 (!%p191_p2), 128, %v271_v34  ;;  %v277_v40 = vand.u32 (!%p191_p2), 15, %v271_v34  ;;  %vm410_vm10 = vcmask (!%p191_p2), 1039360   ;;  %v484_v44 = vld [vmem:[%s882_s3] sm:$0xf] (!%p191_p2) }
   0xb   : > { %254 = vperm.xlu0 (!%p191_p2), %728, %v251_v2   ;;  %vm436_vm11 = vcmask (!%p191_p2), 924672   ;;  %vm475_vm12 = vcmask (!%p191_p2), 908288   ;;  %vm499_vm13 = vcmask (!%p191_p2), 1043456   ;;  %vm495_vm14 = vcmask (!%p191_p2), 293888  }
   0xc   : > { %v247_v12 = vsub.s32 (!%p191_p2), %v244_v10, %v246_v11  ;;  %v284_v41 = vand.u32 (!%p191_p2), 15, %v272_v37  ;;  %vm815_vm2 = vcmp.ge.s32.totalorder (!%p191_p2), %v277_v40, 1  ;;  %vm831_vm6 = vcmp.le.s32.totalorder (!%p191_p2), %v277_v40, 14 }
   0xd   : > { %v400_v4 = vld [vmem:[#allocation2 + $0xc] sm:$0xf]  ;;  %s894_s19 = smov (!%p222_p3, %s684_s19), 1  ;;  %vm587_vm15 = vcmask 3072   ;;  %vm596_vm0 = vcmask 11272  }
   0xe   : > { %408 = vrot.lane.b32.xlu1 %v400_v4, %s743_s24  ;;  %v729_v5 = vld [vmem:[#allocation2 + $0xc] ss:$0 sps:$4 sm:$0xff]   ;;  %s699_s27 = sshll.u32 %s894_s19, 3  ;;  %vm819_vm3 = vcmp.ge.s32.totalorder %v284_v41, 1  ;;  %vm835_vm7 = vcmp.le.s32.totalorder %v284_v41, 14  ;;  %s693_s16 = sshll.u32 %s894_s19, 2 }
   0xf   : > { %v426_v6 = vld [vmem:[#allocation2 + $0xc] sm:$0xf]  ;;  %s226_s30 = scalar_lea.vmem %s879_s0, %s699_s27  ;;  %s231_s15 = scalar_lea.vmem %s883_s4, %s699_s27 }
  0x10   : > { %434 = vrot.lane.b32.xlu0 %v426_v6, %s744_s25  ;;  %v236_v15 = vld [vmem:[%s226_s30] sm:$0xff]  ;;  %v465_v30 = vld [vmem:[#allocation2 + $0xc] sm:$0xf]  ;;  %s235_s21 = scalar_lea.vmem %s884_s5, %s693_s16 }
  0x12   : > { %455 = vrot.lane.b32.xlu1 %v729_v5, %s745_s26 }
  0x80   : > { %v409_v31 = vpop.permute.xlu1 %408 }
  0x84   : > { %v456_v32 = vpop.permute.xlu1 %455 }
  0x86   : > { %v241_v13 = vpop.permute.xlu0 %240 }
  0x87   : > { %v248_v14 = vrot.slane %v241_v13, %v247_v12 }
  0x89   : > { %v250_v17 = vmul.f32 %v248_v14, %v236_v15 }
  0x8a   : > { %v255_v16 = vpop.permute.xlu0 %254 }
  0x8b   : > { %v262_v18 = vrot.slane %v255_v16, %v247_v12 }
  0x8d   : > { %v264_v19 = vadd.f32 %v262_v18, %v250_v17 }
  0x8e   : > { %v813_v33 = vpop.permute.xlu0 %434 }
  0x8f   : > { %v265_v20 = vmax.f32 %v264_v19, 0.0 }
  0x91   : > { %269 = vst [vmem:[#allocation2 + $0x4] sm:$0xff] %v265_v20  ;;  %v395_v21 = vcombine.high %v265_v20, %v265_v20  ;;  %397 = vst [vmem:[#allocation3 + $0x20] sm:$0xf] %v265_v20  ;;  %v449_v29 = vcombine.low %v265_v20, %v265_v20 }
  0x93   : > { %398 = vst [vmem:[#allocation3 + $0x28] sm:$0xf] %v395_v21 }
  0x98   : > { %v369_v22 = vld [vmem:[#allocation2 + $0x8] sm:$0xf]  ;;  %v368_v23 = vld [vmem:[#allocation2] sm:$0xff] }
  0x99   : > { %377 = vrot.lane.b32.xlu1 %v369_v22, %s747_s6  ;;  %373 = vrot.lane.b32.xlu0 %v368_v23, %s747_s6  ;;  %v302_v24 = vld [vmem:[#allocation2 + $0x8] sm:$0xf]  ;;  %v372_v26 = vcombine.high %v368_v23, %v368_v23  ;;  %v329_v28 = vcombine.low %v368_v23, %v368_v23 }
  0x9a   : > { %v345_v25 = vld [vmem:[#allocation2 + $0x8] sm:$0xf] }
  0x9b   : > { %v732_v27 = vld [vmem:[#allocation2 + $0x8] ss:$0 sps:$4 sm:$0xff]  }
  0x9d   : > { %314 = vrot.lane.b32.xlu0 %v302_v24, %s748_s7  ;;  %310 = vrot.lane.b32.xlu1 %v368_v23, %s748_s7 }
  0xa1   : > { %357 = vrot.lane.b32.xlu0 %v345_v25, %s749_s8  ;;  %430 = vrot.lane.b32.xlu1 %v265_v20, %s744_s25 }
  0xa5   : > { %333 = vrot.lane.b32.xlu0 %v368_v23, %s750_s9  ;;  %375 = vrot.lane.b32.xlu1 %v372_v26, %s747_s6 }
  0xa9   : > { %353 = vrot.lane.b32.xlu0 %v368_v23, %s749_s8  ;;  %312 = vrot.lane.b32.xlu1 %v372_v26, %s748_s7 }
  0xad   : > { %404 = vrot.lane.b32.xlu0 %v265_v20, %s743_s24  ;;  %355 = vrot.lane.b32.xlu1 %v372_v26, %s749_s8 }
  0xb1   : > { %453 = vrot.lane.b32.xlu0 %v265_v20, %s745_s26  ;;  %335 = vrot.lane.b32.xlu1 %v732_v27, %s750_s9 }
  0xb5   : > { %406 = vrot.lane.b32.xlu0 %v395_v21, %s743_s24  ;;  %331 = vrot.lane.b32.xlu1 %v329_v28, %s750_s9 }
  0xb9   : > { %451 = vrot.lane.b32.xlu0 %v449_v29, %s745_s26  ;;  %432 = vrot.lane.b32.xlu1 %v395_v21, %s744_s25 }
  0xbd   : > { %473 = vrot.lane.b32.xlu0 %v465_v30, %s751_s10  ;;  %471 = vrot.lane.b32.xlu1 %v395_v21, %s751_s10 }
  0xc1   : > { %469 = vrot.lane.b32.xlu1 %v265_v20, %s751_s10 }
 0x10b   : > { %v378_v35 = vpop.permute.xlu1 %377  ;;  %v374_v36 = vpop.permute.xlu0 %373 }
 0x10f   : > { %v315_v38 = vpop.permute.xlu0 %314  ;;  %v311_v39 = vpop.permute.xlu1 %310 }
 0x113   : > { %v358_v42 = vpop.permute.xlu0 %357  ;;  %v431_v43 = vpop.permute.xlu1 %430 }
 0x117   : > { %v334_v46 = vpop.permute.xlu0 %333  ;;  %v376_v47 = vpop.permute.xlu1 %375 }
 0x118   : > { %v380_v48 = vsel %vm379_vm1, %v374_v36, %v376_v47  ;;  %v381_v49 = vsel %vm379_vm1, %v376_v47, %v378_v35 }
 0x119   : > { %v384_v50 = vsel %vm815_vm2, %v380_v48, 0.0  ;;  %v385_v51 = vsel %vm819_vm3, %v381_v49, 0.0 }
 0x11a   : > { %v388_v52 = vrot.slane %v384_v50, 4  ;;  %v389_v53 = vrot.slane %v385_v51, 4 }
 0x11b   : > { %v354_v54 = vpop.permute.xlu0 %353  ;;  %v313_v55 = vpop.permute.xlu1 %312 }
 0x11c   : > { %392 = vst [vmem:[#allocation3 + $0x10] sm:$0xf0] %v388_v52  ;;  %393 = vst [vmem:[#allocation3 + $0x18] sm:$0xf0] %v389_v53  ;;  %v317_v56 = vsel %vm316_vm4, %v311_v39, %v313_v55  ;;  %v318_v57 = vsel %vm316_vm4, %v313_v55, %v315_v38 }
 0x11d   : > { %v321_v58 = vsel %vm815_vm2, %v317_v56, 0.0  ;;  %v322_v59 = vsel %vm819_vm3, %v318_v57, 0.0 }
 0x11e   : > { %323 = vst [vmem:[#allocation3] sm:$0xf] %v321_v58  ;;  %324 = vst [vmem:[#allocation3 + $0x8] sm:$0xf] %v322_v59 }
 0x11f   : > { %v405_v62 = vpop.permute.xlu0 %404  ;;  %v356_v63 = vpop.permute.xlu1 %355 }
 0x120   : > { %v360_v0 = vsel %vm359_vm5, %v354_v54, %v356_v63  ;;  %v361_v1 = vsel %vm359_vm5, %v356_v63, %v358_v42 }
 0x121   : > { %v364_v2 = vsel %vm831_vm6, %v360_v0, 0.0  ;;  %v365_v3 = vsel %vm835_vm7, %v361_v1, 0.0 }
 0x122   : > { %366 = vst [vmem:[#allocation3 + $0x10] sm:$0xf] %v364_v2  ;;  %367 = vst [vmem:[#allocation3 + $0x18] sm:$0xf] %v365_v3 }
 0x123   : > { %v454_v4 = vpop.permute.xlu0 %453  ;;  %v336_v5 = vpop.permute.xlu1 %335 }
 0x124   : > { %v459_v6 = vsel %vm457_vm8, %v454_v4, %v456_v32  ;;  %v339_v7 = vsel %vm337_vm9, %v334_v46, %v336_v5 }
 0x125   : > { %463 = vst [vmem:[#allocation3 + $0x38] sm:$0xf0] %v459_v6  ;;  %343 = vst [vmem:[#allocation3 + $0x8] sm:$0xf0] %v339_v7 }
 0x127   : > { %v407_v8 = vpop.permute.xlu0 %406  ;;  %v332_v9 = vpop.permute.xlu1 %331 }
 0x128   : > { %v411_v10 = vsel %vm410_vm10, %v405_v62, %v407_v8  ;;  %v412_v11 = vsel %vm410_vm10, %v407_v8, %v409_v31  ;;  %v338_v12 = vsel %vm337_vm9, %v332_v9, %v334_v46 }
 0x129   : > { %v415_v13 = vsel %vm831_vm6, %v411_v10, 0.0  ;;  %v416_v14 = vsel %vm835_vm7, %v412_v11, 0.0  ;;  %342 = vst [vmem:[#allocation3] sm:$0xf0] %v338_v12  ;;  %v488_v23 = vld [vmem:[#allocation3 + $0x18] sm:$0xff]  ;;  %v487_v31 = vld [vmem:[#allocation3 + $0x10] sm:$0xff] }
 0x12a   : > { %v419_v15 = vrot.slane %v415_v13, 4  ;;  %v420_v16 = vrot.slane %v416_v14, 4 }
 0x12b   : > { %v452_v17 = vpop.permute.xlu0 %451  ;;  %v433_v18 = vpop.permute.xlu1 %432 }
 0x12c   : > { %423 = vst [vmem:[#allocation3 + $0x20] sm:$0xf0] %v419_v15  ;;  %424 = vst [vmem:[#allocation3 + $0x28] sm:$0xf0] %v420_v16  ;;  %v458_v19 = vsel %vm457_vm8, %v452_v17, %v454_v4  ;;  %v437_v20 = vsel %vm436_vm11, %v431_v43, %v433_v18  ;;  %v438_v21 = vsel %vm436_vm11, %v433_v18, %v813_v33  ;;  %v486_v22 = vld [vmem:[#allocation3 + $0x8] sm:$0xff] }
 0x12d   : > { %462 = vst [vmem:[#allocation3 + $0x30] sm:$0xf0] %v458_v19  ;;  %v441_v24 = vsel %vm815_vm2, %v437_v20, 0.0  ;;  %v442_v25 = vsel %vm819_vm3, %v438_v21, 0.0  ;;  %v701_v26 = vpack.c.bf16 %v488_v23, %v486_v22 }
 0x12e   : > { %443 = vst [vmem:[#allocation3 + $0x30] sm:$0xf] %v441_v24  ;;  %444 = vst [vmem:[#allocation3 + $0x38] sm:$0xf] %v442_v25 }
 0x12f   : > { %v474_v27 = vpop.permute.xlu0 %473  ;;  %702 = vmatprep.subr.bf16.mxu0 %v701_v26  ;;  %v472_v28 = vpop.permute.xlu1 %471 }
 0x130   : > { %v477_v29 = vsel %vm475_vm12, %v472_v28, %v474_v27  ;;  %v485_v30 = vld [vmem:[#allocation3] sm:$0xff] }
 0x131   : > { %v481_v32 = vsel %vm835_vm7, %v477_v29, 0.0  ;;  %v703_v33 = vpack.c.bf16 %v487_v31, %v485_v30 }
 0x132   : > { %483 = vst [vmem:[#allocation3 + $0x48] sm:$0xf] %v481_v32 }
 0x133   : > { %704 = vmatpush1.bf16.msra.mxu0 %v703_v33  ;;  %v470_v34 = vpop.permute.xlu1 %469  ;;  %v490_v36 = vld [vmem:[#allocation3 + $0x28] sm:$0xff]  ;;  %v489_v39 = vld [vmem:[#allocation3 + $0x20] sm:$0xff] }
 0x134   : > { %v476_v35 = vsel %vm475_vm12, %v470_v34, %v472_v28 }
 0x135   : > { %v480_v37 = vsel %vm831_vm6, %v476_v35, 0.0  ;;  %v492_v38 = vld [vmem:[#allocation3 + $0x38] sm:$0xff]  ;;  %v491_v40 = vld [vmem:[#allocation3 + $0x30] sm:$0xff] }
 0x136   : > { %482 = vst [vmem:[#allocation3 + $0x40] sm:$0xf] %v480_v37  ;;  %v705_v41 = vpack.c.bf16 %v492_v38, %v490_v36  ;;  %v707_v42 = vpack.c.bf16 %v491_v40, %v489_v39 }
 0x138   : > { %706 = vmatprep.subr.bf16.mxu0 %v705_v41 }
 0x139   : > { %708 = vmatpush1.bf16.msra.mxu0 %v707_v42  ;;  %v494_v43 = vld [vmem:[#allocation3 + $0x48] sm:$0xf] }
 0x13a   : > { %694 = vmatprep.subr.msk.mxu0 %vm499_vm13, %v494_v43 }
 0x13d   : > { %v493_v45 = vld [vmem:[#allocation3 + $0x40] sm:$0xf] }
 0x13e   : > { %695 = vmatpush1.msk.msra.mxu0 %vm499_vm13, %v493_v45 }
 0x13f   : > { %696 = vmatmul.mubr.msk.f32.vlgmr.msra.gmra.mrb[0].mxu0 %vm495_vm14, %v484_v44 }
 0x212   : > { %v572_v46 = vpop.f32.mrb[0].mxu0 }
 0x213   : > { %v589_v47 = vmul.f32 %v572_v46, %v572_v46  ;;  %v574_v48 = vpop.f32.mrb[1].mxu0  ;;  %v582_v49 = vsel %vm499_vm13, %v572_v46, 0.0 }
 0x214   : > { %v579_v50 = vcombine.low %v572_v46, %v574_v48  ;;  %v583_v51 = vsel %vm499_vm13, %v574_v48, 0.0  ;;  %v590_v52 = vmul.f32 %v574_v48, %v574_v48 }
 0x215   : > { %v584_v53 = vadd.f32 %v583_v51, %v582_v49  ;;  %v591_v54 = vsel %vm499_vm13, %v589_v47, 0.0 }
 0x216   : > { %581 = vst [vmem:[%s231_s15] sm:$0xff] %v579_v50  ;;  %v592_v55 = vsel %vm499_vm13, %v590_v52, 0.0 }
 0x217   : > { %585 = vadd.xlane.f32.xlu0 %v584_v53  ;;  %v593_v56 = vadd.f32 %v592_v55, %v591_v54 }
 0x219   : > { %594 = vadd.xlane.f32.xlu1 %v593_v56 }
 0x2a4   : > { %v586_v57 = vpop.xlane.xlu0 %585 }
 0x2a5   : > { %588 = vst.msk [vmem:[%s235_s21] sm:$0xf] %vm587_vm15, %v586_v57 }
 0x2a6   : > { %v595_v58 = vpop.xlane.xlu1 %594 }
 0x2a7   : > { %597 = vst.msk [vmem:[%s235_s21] sm:$0xf] %vm596_vm0, %v595_v58 }
 0x2a8 PF: > { %s16_s18 = sadd.s32 1, %s739_s18  }
 0x2a9   : > { %p13_p4 = scmp.ge.s32.totalorder %s16_s18, 4  }
 0x2ab   :  { %15 = sbr.rel (!%p13_p4) target bundleno = 1 (0x1), region = 78 }

</bundles_post_ra>
